<compile_context>
chip_gen: v5e
topology: v5e:2x2
jax: 0.10.0
libtpu: 0.0.40
codegen_flags: <defaults>
</compile_context>

<pallas_src>
import math

import numpy as np
import jax
import jax.numpy as jnp
from jax.experimental import pallas as pl
from jax.experimental.pallas import tpu as pltpu

SIGMA = 25.0          # sigma of marginal_prob_std (VE-SDE)
NEG_SLOPE = 0.01      # torch.nn.LeakyReLU() default negative_slope
HALF_DIM = 8          # timestep embedding dim 16 -> half = 8

# Host-side constants.
_FREQS = np.exp(
    np.arange(HALF_DIM, dtype=np.float32)
    * (-math.log(10000.0) / (HALF_DIM - 1))
)                                                              # (8,)
# cat([sin(t*f), cos(t*f)]) == sin(t*[f, f] + [0, pi/2])  -> one sin, one dot.
_FREQS2 = np.concatenate([_FREQS, _FREQS]).reshape(2 * HALF_DIM, 1).astype(np.float32)
_PHASE = np.concatenate(
    [np.zeros(HALF_DIM, np.float32), np.full(HALF_DIM, np.pi / 2, np.float32)]
).reshape(2 * HALF_DIM, 1)


def _leaky(v):
    return jnp.where(v > 0, v, NEG_SLOPE * v)


def scorenet_kernel(xt_ref, freqs_ref, phase_ref,
                    te_w1, te_b1, te_w2, te_b2,
                    xy_w1a, xy_w1b, xy_b1, xy_w2, xy_b2,
                    n_w1a, n_w1b, n_b1, n_w2, n_b2, n_w3, n_b3,
                    out_ref):
    # Input tile is (3, TB): rows [x, y, t], batch on lanes.
    x0 = xt_ref[0:1, :]                   # (1, TB)
    x1 = xt_ref[1:2, :]                   # (1, TB)
    t = xt_ref[2:3, :]                    # (1, TB)

    # scale = 1 / marginal_prob_std(t), via rsqrt (EUP) instead of sqrt + divide.
    log_sigma = math.log(SIGMA)
    inv_2ls = 1.0 / (2.0 * log_sigma)
    # TODO(synk): use expm1 instead of exp-1 once verified on the target Mosaic
    #             version; for t >= 0.05 (the range exercised here) it is negligible.
    scale = jax.lax.rsqrt((jnp.exp((2.0 * log_sigma) * t) - 1.0) * inv_2ls)   # (1, TB)

    # Sinusoidal timestep embedding (dim 16); cos folded into sin via +pi/2 phase.
    emb = jnp.sin(freqs_ref[...] * t + phase_ref[...])                         # (16, TB)

    # t_encoder: Linear(16->16)+LReLU, Linear(16->32)+LReLU (activate_final).
    h_t = _leaky(jnp.dot(te_w1[...], emb, preferred_element_type=jnp.float32)
                 + te_b1[...])                                                 # (16, TB)
    t_emb = _leaky(jnp.dot(te_w2[...], h_t, preferred_element_type=jnp.float32)
                   + te_b2[...])                                               # (32, TB)

    # xy_encoder: K=2 first layer on the VPU (outer-product FMAs), second on MXU.
    h_xy = _leaky(xy_w1a[...] * x0 + xy_w1b[...] * x1 + xy_b1[...])            # (32, TB)
    xy_emb = _leaky(jnp.dot(xy_w2[...], h_xy, preferred_element_type=jnp.float32)
                    + xy_b2[...])                                              # (64, TB)

    # net: cat([xy_emb, t_emb]) folded by splitting the first weight along its
    # input dim (pre-split in the wrapper).  Big matmuls in bf16, f32 accumulation.
    h1 = _leaky(
        jnp.dot(n_w1a[...], xy_emb.astype(jnp.bfloat16),
                preferred_element_type=jnp.float32)
        + jnp.dot(n_w1b[...], t_emb.astype(jnp.bfloat16),
                  preferred_element_type=jnp.float32)
        + n_b1[...])                                                           # (128, TB)
    h2 = _leaky(jnp.dot(n_w2[...], h1.astype(jnp.bfloat16),
                        preferred_element_type=jnp.float32) + n_b2[...])       # (128, TB)
    out = jnp.dot(n_w3[...], h2, preferred_element_type=jnp.float32) + n_b3[...]  # (2, TB)

    out_ref[...] = out * scale            # lane-dense (2, TB) store


def scorenet_2d(x, params, *, tb=2048):
    """x: (B, 3) with columns [x, y, t]. Returns (B, 2) scores.

    Note: for very small batches (<~1K rows) an XLA-fused MLP (see `reference`)
    beats the Pallas kernel on fixed overhead; this wrapper always runs the
    kernel so the TPU path is exercised.
    """
    (te_w1, te_b1, te_w2, te_b2, xy_w1, xy_b1, xy_w2, xy_b2,
     n_w1, n_b1, n_w2, n_b2, n_w3, n_b3) = params
    B = x.shape[0]

    # Batch tile: multiple of 128 (lane width); don't tile wider than the batch.
    tb = max(128, (int(tb) // 128) * 128)
    tb = min(tb, pl.cdiv(B, 128) * 128)
    Bp = pl.cdiv(B, tb) * tb

    # Batch-on-lanes layout: (3, Bp), pad rows with t=1 so the std stays finite.
    xt = x.T
    if Bp != B:
        xt = jnp.pad(xt, ((0, 0), (0, Bp - B)), constant_values=1.0)

    # bf16 weights for the two big matmuls; pre-split n_w1 along its input dim so
    # the kernel never lane-slices a weight ref.  Likewise split the K=2 xy weight.
    n_w1a = n_w1[:, 0:64].astype(jnp.bfloat16)    # (128, 64)
    n_w1b = n_w1[:, 64:96].astype(jnp.bfloat16)   # (128, 32)
    n_w2_bf = n_w2.astype(jnp.bfloat16)           # (128, 128)
    xy_w1a = xy_w1[:, 0:1]                        # (32, 1)
    xy_w1b = xy_w1[:, 1:2]                        # (32, 1)

    freqs = jnp.asarray(_FREQS2)                  # (16, 1)
    phase = jnp.asarray(_PHASE)                   # (16, 1)

    weights = (te_w1, te_b1, te_w2, te_b2,
               xy_w1a, xy_w1b, xy_b1, xy_w2, xy_b2,
               n_w1a, n_w1b, n_b1, n_w2_bf, n_b2, n_w3, n_b3)

    def resident(a):
        """Full-array block whose index never changes -> stays resident in VMEM."""
        return pl.BlockSpec(a.shape, lambda i: (0, 0))

    in_specs = ([pl.BlockSpec((3, tb), lambda i: (0, i)),
                 resident(freqs), resident(phase)]
                + [resident(w) for w in weights])
    out_spec = pl.BlockSpec((2, tb), lambda i: (0, i))

    # Advisory cost estimate so XLA schedules the surrounding graph sensibly.
    macs_per_row = (16 * 16 + 16 * 32 + 2 * 32 + 32 * 64
                    + 96 * 128 + 128 * 128 + 128 * 2)
    weight_bytes = int(sum(int(w.size) * w.dtype.itemsize for w in weights)
                       + freqs.size * 4 + phase.size * 4)
    cost = pl.CostEstimate(
        flops=2 * macs_per_row * Bp,
        transcendentals=18 * Bp,                      # 16 sin + exp + rsqrt per row
        bytes_accessed=Bp * (3 * 4 + 2 * 4) + weight_bytes)

    out_t = pl.pallas_call(
        scorenet_kernel,
        out_shape=jax.ShapeDtypeStruct((2, Bp), jnp.float32),
        grid=(Bp // tb,),
        in_specs=in_specs,
        out_specs=out_spec,
        compiler_params=pltpu.CompilerParams(
            dimension_semantics=("parallel",)),       # megacore-shardable batch axis
        cost_estimate=cost,
    )(xt, freqs, phase, *weights)

    return out_t[:, :B].T                             # (B, 2)


def init_params(key):
    """Deterministic PyTorch-nn.Linear-style init; weights stored (out, in)."""
    def linear(k, fan_in, fan_out):
        kw, kb = jax.random.split(k)
        bound = 1.0 / math.sqrt(fan_in)
        w = jax.random.uniform(kw, (fan_out, fan_in), minval=-bound, maxval=bound,
                               dtype=jnp.float32)
        b = jax.random.uniform(kb, (fan_out, 1), minval=-bound, maxval=bound,
                               dtype=jnp.float32)
        return w, b

    keys = jax.random.split(key, 7)
    te_w1, te_b1 = linear(keys[0], 16, 16)
    te_w2, te_b2 = linear(keys[1], 16, 32)
    xy_w1, xy_b1 = linear(keys[2], 2, 32)
    xy_w2, xy_b2 = linear(keys[3], 32, 64)
    n_w1, n_b1 = linear(keys[4], 96, 128)
    n_w2, n_b2 = linear(keys[5], 128, 128)
    n_w3, n_b3 = linear(keys[6], 128, 2)
    return (te_w1, te_b1, te_w2, te_b2,
            xy_w1, xy_b1, xy_w2, xy_b2,
            n_w1, n_b1, n_w2, n_b2, n_w3, n_b3)


def reference(x, params):
    """Pure-JAX mirror of the PyTorch forward, bf16-matched on the two big matmuls."""
    (te_w1, te_b1, te_w2, te_b2, xy_w1, xy_b1, xy_w2, xy_b2,
     n_w1, n_b1, n_w2, n_b2, n_w3, n_b3) = params
    lk = lambda v: jnp.where(v > 0, v, NEG_SLOPE * v)
    lin = lambda h, w, b: h @ w.T + b.T          # torch-orientation weights (out, in)

    t = x[:, -1]
    log_sigma = math.log(SIGMA)
    norm = jnp.sqrt((jnp.exp(2.0 * t * log_sigma) - 1.0) / (2.0 * log_sigma))[:, None]
    t = t.reshape(-1, 1)
    xy = x[:, 0:2]

    ang = t * jnp.asarray(_FREQS).reshape(1, HALF_DIM)
    t_emb = jnp.concatenate([jnp.sin(ang), jnp.cos(ang)], axis=-1)

    t_emb = lk(lin(lk(lin(t_emb, te_w1, te_b1)), te_w2, te_b2))
    xy_emb = lk(lin(lk(lin(xy, xy_w1, xy_b1)), xy_w2, xy_b2))
    h = jnp.concatenate([xy_emb, t_emb], axis=-1)

    # Match the kernel's bf16 operands on the two large matmuls.
    h1 = lk(jnp.dot(h.astype(jnp.bfloat16), n_w1.T.astype(jnp.bfloat16),
                    preferred_element_type=jnp.float32) + n_b1.T)
    h2 = lk(jnp.dot(h1.astype(jnp.bfloat16), n_w2.T.astype(jnp.bfloat16),
                    preferred_element_type=jnp.float32) + n_b2.T)
    out = h2 @ n_w3.T + n_b3.T
    return out / norm


if __name__ == "__main__":
    key = jax.random.PRNGKey(0)
    kx, kt, kp = jax.random.split(key, 3)

    B = 512
    xy_in = jax.random.normal(kx, (B, 2), dtype=jnp.float32)
    t_in = jax.random.uniform(kt, (B, 1), minval=0.05, maxval=1.0, dtype=jnp.float32)
    x = jnp.concatenate([xy_in, t_in], axis=-1)          # (B, 3): columns [x, y, t]

    params = init_params(kp)

    out = scorenet_2d(x, params, tb=128)                 # grid=(4,): exercises pipelining
    out = jax.block_until_ready(out)

    ref = reference(x, params)
    assert out.shape == (B, 2)
    assert jnp.allclose(out, ref, atol=5e-3, rtol=5e-3), (
        float(jnp.max(jnp.abs(out - ref))))

    print("KERNEL_OK")
</pallas_src>

<mosaic_0001>
module attributes {stable_mosaic.version = 11 : i64} {
  func.func @scorenet_kernel(%arg0: i32, %arg1: memref<3x128xf32, #tpu.memory_space<vmem>>, %arg2: memref<16x1xf32, #tpu.memory_space<vmem>>, %arg3: memref<16x1xf32, #tpu.memory_space<vmem>>, %arg4: memref<16x16xf32, #tpu.memory_space<vmem>>, %arg5: memref<16x1xf32, #tpu.memory_space<vmem>>, %arg6: memref<32x16xf32, #tpu.memory_space<vmem>>, %arg7: memref<32x1xf32, #tpu.memory_space<vmem>>, %arg8: memref<32x1xf32, #tpu.memory_space<vmem>>, %arg9: memref<32x1xf32, #tpu.memory_space<vmem>>, %arg10: memref<32x1xf32, #tpu.memory_space<vmem>>, %arg11: memref<64x32xf32, #tpu.memory_space<vmem>>, %arg12: memref<64x1xf32, #tpu.memory_space<vmem>>, %arg13: memref<128x64xbf16, #tpu.memory_space<vmem>>, %arg14: memref<128x32xbf16, #tpu.memory_space<vmem>>, %arg15: memref<128x1xf32, #tpu.memory_space<vmem>>, %arg16: memref<128x128xbf16, #tpu.memory_space<vmem>>, %arg17: memref<128x1xf32, #tpu.memory_space<vmem>>, %arg18: memref<2x128xf32, #tpu.memory_space<vmem>>, %arg19: memref<2x1xf32, #tpu.memory_space<vmem>>, %arg20: memref<2x128xf32, #tpu.memory_space<vmem>>) attributes {dimension_semantics = [#tpu.dimension_semantics<parallel>], iteration_bounds = array<i64: 4>, scalar_prefetch = 0 : i64, scratch_operands = 0 : i64, tpu.core_type = #tpu.core_type<tc>, window_params = [{transform_indices = @transform_0, window_bounds = array<i64: 3, 128>}, {pipeline_mode = #tpu.pipeline_mode<synchronous>, transform_indices = @transform_1, window_bounds = array<i64: 16, 1>}, {pipeline_mode = #tpu.pipeline_mode<synchronous>, transform_indices = @transform_2, window_bounds = array<i64: 16, 1>}, {pipeline_mode = #tpu.pipeline_mode<synchronous>, transform_indices = @transform_3, window_bounds = array<i64: 16, 16>}, {pipeline_mode = #tpu.pipeline_mode<synchronous>, transform_indices = @transform_4, window_bounds = array<i64: 16, 1>}, {pipeline_mode = #tpu.pipeline_mode<synchronous>, transform_indices = @transform_5, window_bounds = array<i64: 32, 16>}, {pipeline_mode = #tpu.pipeline_mode<synchronous>, transform_indices = @transform_6, window_bounds = array<i64: 32, 1>}, {pipeline_mode = #tpu.pipeline_mode<synchronous>, transform_indices = @transform_7, window_bounds = array<i64: 32, 1>}, {pipeline_mode = #tpu.pipeline_mode<synchronous>, transform_indices = @transform_8, window_bounds = array<i64: 32, 1>}, {pipeline_mode = #tpu.pipeline_mode<synchronous>, transform_indices = @transform_9, window_bounds = array<i64: 32, 1>}, {pipeline_mode = #tpu.pipeline_mode<synchronous>, transform_indices = @transform_10, window_bounds = array<i64: 64, 32>}, {pipeline_mode = #tpu.pipeline_mode<synchronous>, transform_indices = @transform_11, window_bounds = array<i64: 64, 1>}, {pipeline_mode = #tpu.pipeline_mode<synchronous>, transform_indices = @transform_12, window_bounds = array<i64: 128, 64>}, {pipeline_mode = #tpu.pipeline_mode<synchronous>, transform_indices = @transform_13, window_bounds = array<i64: 128, 32>}, {pipeline_mode = #tpu.pipeline_mode<synchronous>, transform_indices = @transform_14, window_bounds = array<i64: 128, 1>}, {pipeline_mode = #tpu.pipeline_mode<synchronous>, transform_indices = @transform_15, window_bounds = array<i64: 128, 128>}, {pipeline_mode = #tpu.pipeline_mode<synchronous>, transform_indices = @transform_16, window_bounds = array<i64: 128, 1>}, {pipeline_mode = #tpu.pipeline_mode<synchronous>, transform_indices = @transform_17, window_bounds = array<i64: 2, 128>}, {pipeline_mode = #tpu.pipeline_mode<synchronous>, transform_indices = @transform_18, window_bounds = array<i64: 2, 1>}, {transform_indices = @transform_19, window_bounds = array<i64: 2, 128>}]} {
    %c0 = arith.constant 0 : index
    %c0_0 = arith.constant 0 : index
    %0 = vector.load %arg1[%c0, %c0_0] : memref<3x128xf32, #tpu.memory_space<vmem>>, vector<1x128xf32>
    %c1 = arith.constant 1 : index
    %c0_1 = arith.constant 0 : index
    %1 = vector.load %arg1[%c1, %c0_1] : memref<3x128xf32, #tpu.memory_space<vmem>>, vector<1x128xf32>
    %c2 = arith.constant 2 : index
    %c0_2 = arith.constant 0 : index
    %2 = vector.load %arg1[%c2, %c0_2] : memref<3x128xf32, #tpu.memory_space<vmem>>, vector<1x128xf32>
    %cst = arith.constant 6.43775177 : f32
    %3 = vector.broadcast %cst : f32 to vector<1x128xf32>
    %4 = arith.mulf %3, %2 : vector<1x128xf32>
    %5 = math.exp %4 : vector<1x128xf32>
    %cst_3 = arith.constant 1.000000e+00 : f32
    %6 = vector.broadcast %cst_3 : f32 to vector<1x128xf32>
    %7 = arith.subf %5, %6 : vector<1x128xf32>
    %cst_4 = arith.constant 0.155333728 : f32
    %8 = vector.broadcast %cst_4 : f32 to vector<1x128xf32>
    %9 = arith.mulf %7, %8 : vector<1x128xf32>
    %10 = math.rsqrt %9 : vector<1x128xf32>
    %c0_5 = arith.constant 0 : index
    %c0_6 = arith.constant 0 : index
    %11 = vector.load %arg2[%c0_5, %c0_6] : memref<16x1xf32, #tpu.memory_space<vmem>>, vector<16x1xf32>
    %12 = vector.broadcast %11 : vector<16x1xf32> to vector<16x128xf32>
    %13 = vector.broadcast %2 : vector<1x128xf32> to vector<16x128xf32>
    %14 = arith.mulf %12, %13 : vector<16x128xf32>
    %c0_7 = arith.constant 0 : index
    %c0_8 = arith.constant 0 : index
    %15 = vector.load %arg3[%c0_7, %c0_8] : memref<16x1xf32, #tpu.memory_space<vmem>>, vector<16x1xf32>
    %16 = vector.broadcast %15 : vector<16x1xf32> to vector<16x128xf32>
    %17 = arith.addf %14, %16 : vector<16x128xf32>
    %18 = math.sin %17 : vector<16x128xf32>
    %c0_9 = arith.constant 0 : index
    %c0_10 = arith.constant 0 : index
    %19 = vector.load %arg4[%c0_9, %c0_10] : memref<16x16xf32, #tpu.memory_space<vmem>>, vector<16x16xf32>
    %cst_11 = arith.constant dense<0.000000e+00> : vector<16x128xf32>
    %20 = tpu.matmul %19, %18, %cst_11 {dimension_numbers = #tpu.dot_dimension_numbers<[1], [0], [0], [1], [0, 0, 1, 1], [], []>} : vector<16x16xf32>, vector<16x128xf32>, vector<16x128xf32> -> vector<16x128xf32>
    %c0_12 = arith.constant 0 : index
    %c0_13 = arith.constant 0 : index
    %21 = vector.load %arg5[%c0_12, %c0_13] : memref<16x1xf32, #tpu.memory_space<vmem>>, vector<16x1xf32>
    %22 = vector.broadcast %21 : vector<16x1xf32> to vector<16x128xf32>
    %23 = arith.addf %20, %22 : vector<16x128xf32>
    %cst_14 = arith.constant 0.000000e+00 : f32
    %24 = vector.broadcast %cst_14 : f32 to vector<16x128xf32>
    %25 = arith.cmpf ogt, %23, %24 : vector<16x128xf32>
    %cst_15 = arith.constant 0.00999999977 : f32
    %26 = vector.broadcast %cst_15 : f32 to vector<16x128xf32>
    %27 = arith.mulf %26, %23 : vector<16x128xf32>
    %28 = arith.select %25, %23, %27 : vector<16x128xi1>, vector<16x128xf32>
    %c0_16 = arith.constant 0 : index
    %c0_17 = arith.constant 0 : index
    %29 = vector.load %arg6[%c0_16, %c0_17] : memref<32x16xf32, #tpu.memory_space<vmem>>, vector<32x16xf32>
    %cst_18 = arith.constant dense<0.000000e+00> : vector<32x128xf32>
    %30 = tpu.matmul %29, %28, %cst_18 {dimension_numbers = #tpu.dot_dimension_numbers<[1], [0], [0], [1], [0, 0, 1, 1], [], []>} : vector<32x16xf32>, vector<16x128xf32>, vector<32x128xf32> -> vector<32x128xf32>
    %c0_19 = arith.constant 0 : index
    %c0_20 = arith.constant 0 : index
    %31 = vector.load %arg7[%c0_19, %c0_20] : memref<32x1xf32, #tpu.memory_space<vmem>>, vector<32x1xf32>
    %32 = vector.broadcast %31 : vector<32x1xf32> to vector<32x128xf32>
    %33 = arith.addf %30, %32 : vector<32x128xf32>
    %cst_21 = arith.constant 0.000000e+00 : f32
    %34 = vector.broadcast %cst_21 : f32 to vector<32x128xf32>
    %35 = arith.cmpf ogt, %33, %34 : vector<32x128xf32>
    %cst_22 = arith.constant 0.00999999977 : f32
    %36 = vector.broadcast %cst_22 : f32 to vector<32x128xf32>
    %37 = arith.mulf %36, %33 : vector<32x128xf32>
    %38 = arith.select %35, %33, %37 : vector<32x128xi1>, vector<32x128xf32>
    %c0_23 = arith.constant 0 : index
    %c0_24 = arith.constant 0 : index
    %39 = vector.load %arg8[%c0_23, %c0_24] : memref<32x1xf32, #tpu.memory_space<vmem>>, vector<32x1xf32>
    %40 = vector.broadcast %39 : vector<32x1xf32> to vector<32x128xf32>
    %41 = vector.broadcast %0 : vector<1x128xf32> to vector<32x128xf32>
    %42 = arith.mulf %40, %41 : vector<32x128xf32>
    %c0_25 = arith.constant 0 : index
    %c0_26 = arith.constant 0 : index
    %43 = vector.load %arg9[%c0_25, %c0_26] : memref<32x1xf32, #tpu.memory_space<vmem>>, vector<32x1xf32>
    %44 = vector.broadcast %43 : vector<32x1xf32> to vector<32x128xf32>
    %45 = vector.broadcast %1 : vector<1x128xf32> to vector<32x128xf32>
    %46 = arith.mulf %44, %45 : vector<32x128xf32>
    %47 = arith.addf %42, %46 : vector<32x128xf32>
    %c0_27 = arith.constant 0 : index
    %c0_28 = arith.constant 0 : index
    %48 = vector.load %arg10[%c0_27, %c0_28] : memref<32x1xf32, #tpu.memory_space<vmem>>, vector<32x1xf32>
    %49 = vector.broadcast %48 : vector<32x1xf32> to vector<32x128xf32>
    %50 = arith.addf %47, %49 : vector<32x128xf32>
    %cst_29 = arith.constant 0.000000e+00 : f32
    %51 = vector.broadcast %cst_29 : f32 to vector<32x128xf32>
    %52 = arith.cmpf ogt, %50, %51 : vector<32x128xf32>
    %cst_30 = arith.constant 0.00999999977 : f32
    %53 = vector.broadcast %cst_30 : f32 to vector<32x128xf32>
    %54 = arith.mulf %53, %50 : vector<32x128xf32>
    %55 = arith.select %52, %50, %54 : vector<32x128xi1>, vector<32x128xf32>
    %c0_31 = arith.constant 0 : index
    %c0_32 = arith.constant 0 : index
    %56 = vector.load %arg11[%c0_31, %c0_32] : memref<64x32xf32, #tpu.memory_space<vmem>>, vector<64x32xf32>
    %cst_33 = arith.constant dense<0.000000e+00> : vector<64x128xf32>
    %57 = tpu.matmul %56, %55, %cst_33 {dimension_numbers = #tpu.dot_dimension_numbers<[1], [0], [0], [1], [0, 0, 1, 1], [], []>} : vector<64x32xf32>, vector<32x128xf32>, vector<64x128xf32> -> vector<64x128xf32>
    %c0_34 = arith.constant 0 : index
    %c0_35 = arith.constant 0 : index
    %58 = vector.load %arg12[%c0_34, %c0_35] : memref<64x1xf32, #tpu.memory_space<vmem>>, vector<64x1xf32>
    %59 = vector.broadcast %58 : vector<64x1xf32> to vector<64x128xf32>
    %60 = arith.addf %57, %59 : vector<64x128xf32>
    %cst_36 = arith.constant 0.000000e+00 : f32
    %61 = vector.broadcast %cst_36 : f32 to vector<64x128xf32>
    %62 = arith.cmpf ogt, %60, %61 : vector<64x128xf32>
    %cst_37 = arith.constant 0.00999999977 : f32
    %63 = vector.broadcast %cst_37 : f32 to vector<64x128xf32>
    %64 = arith.mulf %63, %60 : vector<64x128xf32>
    %65 = arith.select %62, %60, %64 : vector<64x128xi1>, vector<64x128xf32>
    %c0_38 = arith.constant 0 : index
    %c0_39 = arith.constant 0 : index
    %66 = vector.load %arg13[%c0_38, %c0_39] : memref<128x64xbf16, #tpu.memory_space<vmem>>, vector<128x64xbf16>
    %67 = arith.truncf %65 : vector<64x128xf32> to vector<64x128xbf16>
    %cst_40 = arith.constant dense<0.000000e+00> : vector<128x128xf32>
    %68 = tpu.matmul %66, %67, %cst_40 {dimension_numbers = #tpu.dot_dimension_numbers<[1], [0], [0], [1], [0, 0, 1, 1], [], []>} : vector<128x64xbf16>, vector<64x128xbf16>, vector<128x128xf32> -> vector<128x128xf32>
    %c0_41 = arith.constant 0 : index
    %c0_42 = arith.constant 0 : index
    %69 = vector.load %arg14[%c0_41, %c0_42] : memref<128x32xbf16, #tpu.memory_space<vmem>>, vector<128x32xbf16>
    %70 = arith.truncf %38 : vector<32x128xf32> to vector<32x128xbf16>
    %cst_43 = arith.constant dense<0.000000e+00> : vector<128x128xf32>
    %71 = tpu.matmul %69, %70, %cst_43 {dimension_numbers = #tpu.dot_dimension_numbers<[1], [0], [0], [1], [0, 0, 1, 1], [], []>} : vector<128x32xbf16>, vector<32x128xbf16>, vector<128x128xf32> -> vector<128x128xf32>
    %72 = arith.addf %68, %71 : vector<128x128xf32>
    %c0_44 = arith.constant 0 : index
    %c0_45 = arith.constant 0 : index
    %73 = vector.load %arg15[%c0_44, %c0_45] : memref<128x1xf32, #tpu.memory_space<vmem>>, vector<128x1xf32>
    %74 = vector.broadcast %73 : vector<128x1xf32> to vector<128x128xf32>
    %75 = arith.addf %72, %74 : vector<128x128xf32>
    %cst_46 = arith.constant 0.000000e+00 : f32
    %76 = vector.broadcast %cst_46 : f32 to vector<128x128xf32>
    %77 = arith.cmpf ogt, %75, %76 : vector<128x128xf32>
    %cst_47 = arith.constant 0.00999999977 : f32
    %78 = vector.broadcast %cst_47 : f32 to vector<128x128xf32>
    %79 = arith.mulf %78, %75 : vector<128x128xf32>
    %80 = arith.select %77, %75, %79 : vector<128x128xi1>, vector<128x128xf32>
    %c0_48 = arith.constant 0 : index
    %c0_49 = arith.constant 0 : index
    %81 = vector.load %arg16[%c0_48, %c0_49] : memref<128x128xbf16, #tpu.memory_space<vmem>>, vector<128x128xbf16>
    %82 = arith.truncf %80 : vector<128x128xf32> to vector<128x128xbf16>
    %cst_50 = arith.constant dense<0.000000e+00> : vector<128x128xf32>
    %83 = tpu.matmul %81, %82, %cst_50 {dimension_numbers = #tpu.dot_dimension_numbers<[1], [0], [0], [1], [0, 0, 1, 1], [], []>} : vector<128x128xbf16>, vector<128x128xbf16>, vector<128x128xf32> -> vector<128x128xf32>
    %c0_51 = arith.constant 0 : index
    %c0_52 = arith.constant 0 : index
    %84 = vector.load %arg17[%c0_51, %c0_52] : memref<128x1xf32, #tpu.memory_space<vmem>>, vector<128x1xf32>
    %85 = vector.broadcast %84 : vector<128x1xf32> to vector<128x128xf32>
    %86 = arith.addf %83, %85 : vector<128x128xf32>
    %cst_53 = arith.constant 0.000000e+00 : f32
    %87 = vector.broadcast %cst_53 : f32 to vector<128x128xf32>
    %88 = arith.cmpf ogt, %86, %87 : vector<128x128xf32>
    %cst_54 = arith.constant 0.00999999977 : f32
    %89 = vector.broadcast %cst_54 : f32 to vector<128x128xf32>
    %90 = arith.mulf %89, %86 : vector<128x128xf32>
    %91 = arith.select %88, %86, %90 : vector<128x128xi1>, vector<128x128xf32>
    %c0_55 = arith.constant 0 : index
    %c0_56 = arith.constant 0 : index
    %92 = vector.load %arg18[%c0_55, %c0_56] : memref<2x128xf32, #tpu.memory_space<vmem>>, vector<2x128xf32>
    %cst_57 = arith.constant dense<0.000000e+00> : vector<2x128xf32>
    %93 = tpu.matmul %92, %91, %cst_57 {dimension_numbers = #tpu.dot_dimension_numbers<[1], [0], [0], [1], [0, 0, 1, 1], [], []>} : vector<2x128xf32>, vector<128x128xf32>, vector<2x128xf32> -> vector<2x128xf32>
    %c0_58 = arith.constant 0 : index
    %c0_59 = arith.constant 0 : index
    %94 = vector.load %arg19[%c0_58, %c0_59] : memref<2x1xf32, #tpu.memory_space<vmem>>, vector<2x1xf32>
    %95 = vector.broadcast %94 : vector<2x1xf32> to vector<2x128xf32>
    %96 = arith.addf %93, %95 : vector<2x128xf32>
    %97 = vector.broadcast %10 : vector<1x128xf32> to vector<2x128xf32>
    %98 = arith.mulf %96, %97 : vector<2x128xf32>
    %c0_60 = arith.constant 0 : index
    %c0_61 = arith.constant 0 : index
    %99 = vector.load %arg20[%c0_60, %c0_61] : memref<2x128xf32, #tpu.memory_space<vmem>>, vector<2x128xf32>
    tpu.vector_store %arg20[%c0_60, %c0_61], %98 {strides = array<i32>} : memref<2x128xf32, #tpu.memory_space<vmem>>, vector<2x128xf32>,
    return
  }
  func.func @transform_0(%arg0: i32) -> (i32, i32) {
    %c0_i32 = arith.constant 0 : i32
    %c0_i32_0 = arith.constant 0 : i32
    return %c0_i32, %arg0 : i32, i32
  }
  func.func @transform_1(%arg0: i32) -> (i32, i32) {
    %c0_i32 = arith.constant 0 : i32
    %c0_i32_0 = arith.constant 0 : i32
    %c0_i32_1 = arith.constant 0 : i32
    return %c0_i32, %c0_i32_0 : i32, i32
  }
  func.func @transform_2(%arg0: i32) -> (i32, i32) {
    %c0_i32 = arith.constant 0 : i32
    %c0_i32_0 = arith.constant 0 : i32
    %c0_i32_1 = arith.constant 0 : i32
    return %c0_i32, %c0_i32_0 : i32, i32
  }
  func.func @transform_3(%arg0: i32) -> (i32, i32) {
    %c0_i32 = arith.constant 0 : i32
    %c0_i32_0 = arith.constant 0 : i32
    %c0_i32_1 = arith.constant 0 : i32
    return %c0_i32, %c0_i32_0 : i32, i32
  }
  func.func @transform_4(%arg0: i32) -> (i32, i32) {
    %c0_i32 = arith.constant 0 : i32
    %c0_i32_0 = arith.constant 0 : i32
    %c0_i32_1 = arith.constant 0 : i32
    return %c0_i32, %c0_i32_0 : i32, i32
  }
  func.func @transform_5(%arg0: i32) -> (i32, i32) {
    %c0_i32 = arith.constant 0 : i32
    %c0_i32_0 = arith.constant 0 : i32
    %c0_i32_1 = arith.constant 0 : i32
    return %c0_i32, %c0_i32_0 : i32, i32
  }
  func.func @transform_6(%arg0: i32) -> (i32, i32) {
    %c0_i32 = arith.constant 0 : i32
    %c0_i32_0 = arith.constant 0 : i32
    %c0_i32_1 = arith.constant 0 : i32
    return %c0_i32, %c0_i32_0 : i32, i32
  }
  func.func @transform_7(%arg0: i32) -> (i32, i32) {
    %c0_i32 = arith.constant 0 : i32
    %c0_i32_0 = arith.constant 0 : i32
    %c0_i32_1 = arith.constant 0 : i32
    return %c0_i32, %c0_i32_0 : i32, i32
  }
  func.func @transform_8(%arg0: i32) -> (i32, i32) {
    %c0_i32 = arith.constant 0 : i32
    %c0_i32_0 = arith.constant 0 : i32
    %c0_i32_1 = arith.constant 0 : i32
    return %c0_i32, %c0_i32_0 : i32, i32
  }
  func.func @transform_9(%arg0: i32) -> (i32, i32) {
    %c0_i32 = arith.constant 0 : i32
    %c0_i32_0 = arith.constant 0 : i32
    %c0_i32_1 = arith.constant 0 : i32
    return %c0_i32, %c0_i32_0 : i32, i32
  }
  func.func @transform_10(%arg0: i32) -> (i32, i32) {
    %c0_i32 = arith.constant 0 : i32
    %c0_i32_0 = arith.constant 0 : i32
    %c0_i32_1 = arith.constant 0 : i32
    return %c0_i32, %c0_i32_0 : i32, i32
  }
  func.func @transform_11(%arg0: i32) -> (i32, i32) {
    %c0_i32 = arith.constant 0 : i32
    %c0_i32_0 = arith.constant 0 : i32
    %c0_i32_1 = arith.constant 0 : i32
    return %c0_i32, %c0_i32_0 : i32, i32
  }
  func.func @transform_12(%arg0: i32) -> (i32, i32) {
    %c0_i32 = arith.constant 0 : i32
    %c0_i32_0 = arith.constant 0 : i32
    %c0_i32_1 = arith.constant 0 : i32
    return %c0_i32, %c0_i32_0 : i32, i32
  }
  func.func @transform_13(%arg0: i32) -> (i32, i32) {
    %c0_i32 = arith.constant 0 : i32
    %c0_i32_0 = arith.constant 0 : i32
    %c0_i32_1 = arith.constant 0 : i32
    return %c0_i32, %c0_i32_0 : i32, i32
  }
  func.func @transform_14(%arg0: i32) -> (i32, i32) {
    %c0_i32 = arith.constant 0 : i32
    %c0_i32_0 = arith.constant 0 : i32
    %c0_i32_1 = arith.constant 0 : i32
    return %c0_i32, %c0_i32_0 : i32, i32
  }
  func.func @transform_15(%arg0: i32) -> (i32, i32) {
    %c0_i32 = arith.constant 0 : i32
    %c0_i32_0 = arith.constant 0 : i32
    %c0_i32_1 = arith.constant 0 : i32
    return %c0_i32, %c0_i32_0 : i32, i32
  }
  func.func @transform_16(%arg0: i32) -> (i32, i32) {
    %c0_i32 = arith.constant 0 : i32
    %c0_i32_0 = arith.constant 0 : i32
    %c0_i32_1 = arith.constant 0 : i32
    return %c0_i32, %c0_i32_0 : i32, i32
  }
  func.func @transform_17(%arg0: i32) -> (i32, i32) {
    %c0_i32 = arith.constant 0 : i32
    %c0_i32_0 = arith.constant 0 : i32
    %c0_i32_1 = arith.constant 0 : i32
    return %c0_i32, %c0_i32_0 : i32, i32
  }
  func.func @transform_18(%arg0: i32) -> (i32, i32) {
    %c0_i32 = arith.constant 0 : i32
    %c0_i32_0 = arith.constant 0 : i32
    %c0_i32_1 = arith.constant 0 : i32
    return %c0_i32, %c0_i32_0 : i32, i32
  }
  func.func @transform_19(%arg0: i32) -> (i32, i32) {
    %c0_i32 = arith.constant 0 : i32
    %c0_i32_0 = arith.constant 0 : i32
    return %c0_i32, %arg0 : i32, i32
  }
}

</mosaic_0001>

<bundles_post_ra>
// kernel: tpu_custom_call.1
= control target key start
LH: loop header
LB: loop body
LE: loop exit
PB: predicated region body
PF: predicated region fallthrough
CT: control target
= control target key end

     0   :  { %s3206_s0 = inlined_call_operand.vmem [shape: f32[3,512], index: 0, kind: input, shape index: {}]   ;;  %s3207_s1 = inlined_call_operand.vmem [shape: f32[16,1], index: 1, kind: input, shape index: {}]   ;;  %s3208_s2 = inlined_call_operand.vmem [shape: f32[16,1], index: 2, kind: input, shape index: {}]   ;;  %s3209_s3 = inlined_call_operand.vmem [shape: f32[16,16], index: 3, kind: input, shape index: {}]   ;;  %s3210_s4 = inlined_call_operand.vmem [shape: f32[16,1], index: 4, kind: input, shape index: {}]   ;;  %s3211_s5 = inlined_call_operand.vmem [shape: f32[32,16], index: 5, kind: input, shape index: {}]   ;;  %s3212_s6 = inlined_call_operand.vmem [shape: f32[32,1], index: 6, kind: input, shape index: {}]   ;;  %s3213_s7 = inlined_call_operand.vmem [shape: f32[32,1], index: 7, kind: input, shape index: {}]   ;;  %s3214_s8 = inlined_call_operand.vmem [shape: f32[32,1], index: 8, kind: input, shape index: {}]   ;;  %s3215_s9 = inlined_call_operand.vmem [shape: f32[32,1], index: 9, kind: input, shape index: {}]   ;;  %s3216_s10 = inlined_call_operand.vmem [shape: f32[64,32], index: 10, kind: input, shape index: {}]   ;;  %s3217_s11 = inlined_call_operand.vmem [shape: f32[64,1], index: 11, kind: input, shape index: {}]   ;;  %s3218_s12 = inlined_call_operand.vmem [shape: bf16[128,64], index: 12, kind: input, shape index: {}]   ;;  %s3219_s13 = inlined_call_operand.vmem [shape: bf16[128,32], index: 13, kind: input, shape index: {}]   ;;  %s3220_s14 = inlined_call_operand.vmem [shape: f32[128,1], index: 14, kind: input, shape index: {}]   ;;  %s3221_s15 = inlined_call_operand.vmem [shape: bf16[128,128], index: 15, kind: input, shape index: {}]   ;;  %s3222_s16 = inlined_call_operand.vmem [shape: f32[128,1], index: 16, kind: input, shape index: {}]   ;;  %s3223_s17 = inlined_call_operand.vmem [shape: f32[2,128], index: 17, kind: input, shape index: {}]   ;;  %s3224_s18 = inlined_call_operand.vmem [shape: f32[2,1], index: 18, kind: input, shape index: {}]   ;;  %s3225_s19 = inlined_call_operand.hbm [shape: f32[2,512], index: 19, kind: output, shape index: {}]  }
   0x1   :  { %3239 = sst [smem:[#allocation13_spill]] %s3206_s0 }
   0x2   :  { %3240 = sst [smem:[#allocation14_spill]] %s3207_s1 }
   0x3   :  { %3241 = sst [smem:[#allocation15_spill]] %s3208_s2 }
   0x4   :  { %3242 = sst [smem:[#allocation16_spill]] %s3209_s3 }
   0x5   :  { %3243 = sst [smem:[#allocation17_spill]] %s3210_s4 }
   0x6   :  { %3244 = sst [smem:[#allocation18_spill]] %s3211_s5 }
   0x7   :  { %3245 = sst [smem:[#allocation19_spill]] %s3212_s6 }
   0x8   :  { %3246 = sst [smem:[#allocation20_spill]] %s3213_s7 }
   0x9   :  { %3247 = sst [smem:[#allocation21_spill]] %s3225_s19 }
   0xa   :  { %24 = vsyncpa [#allocation3], 0 }
   0xb   :  { %26 = vsyncpa [#allocation3 + $0x1], 0  ;;  %s2532_s0 = smov 0   ;;  %s2534_s30 = smov 0  }
   0xc   :  { %s2536_s20 = smov 0   ;;  %s2538_s21 = smov 0  }
   0xd LB: > { %3248 = sst [smem:[#allocation5_spill]] %s2411_s0  ;;  %s2553_s1 = sadd.s32 4294967295, %s2423_s21   ;;  %s2423_s21 = sphi %s2538_s21, %s3276_s21   ;;  %s2419_s20 = sphi %s2536_s20, %s3278_s20   ;;  %s2415_s30 = sphi %s2534_s30, %s3280_s30   ;;  %s2411_s0 = sphi %s2532_s0, %s3279_s0  }
   0xe   : > { %3249 = sst [smem:[#allocation6_spill]] %s2419_s20  ;;  %s2130_s22 = sadd.s32 4294967294, %s2423_s21  }
   0xf   : > { %3250 = sst [smem:[#allocation7_spill]] %s2423_s21  ;;  %s2557_s2 = sadd.s32 1, %s2423_s21  }
  0x10   : > { %3251 = sst [smem:[#allocation8_spill]] %s2553_s1  ;;  %s443_s23 = sadd.s32 1, %s2419_s20 }
  0x11   : > { %3252 = sst [smem:[#allocation9_spill]] %s2557_s2  ;;  %s440_s24 = ssub.s32 %s2423_s21, %s2557_s2 }
  0x12   : > { %p453_p0 = scmp.ne.s32.totalorder %s2419_s20, %s2415_s30  ;;  %p441_p1 = scmp.eq.s32.totalorder %s440_s24, 0 }
  0x13   : > { %p454_p2 = scmp.eq.s32.totalorder %s2553_s1, 3  ;;  %p459_p3 = scmp.ne.s32.totalorder %s2415_s30, %s2411_s0 }
  0x14   : > { %p460_p4 = scmp.eq.s32.totalorder %s2130_s22, 3  ;;  %p2133_p7 = scmp.ge.s32.totalorder %s2423_s21, 1 }
  0x15   : > { %s2568_s25 = scalar_select %p441_p1, %s2419_s20, %s443_s23  }
  0x16   : > { %p2570_p5 = por %p454_p2, %p453_p0  ;;  %p2574_p6 = por %p460_p4, %p459_p3 }
  0x17   : > { %3253 = sst [smem:[#allocation10_spill]] %s2568_s25  ;;  %p539_p8 = scmp.lt.s32.totalorder %s2423_s21, 5 }
  0x18   : > { %s3254_s3 = scalar_select %p2570_p5, 1, 0 }
  0x19   : > { %s3256_s26 = scalar_select %p2574_p6, 1, 0 }
  0x1a   : > { %3255 = sst [smem:[#allocation11_spill]] %s3254_s3  ;;  %p540_p9 = pnand %p2133_p7, %p539_p8 }
  0x1b   : > { %3257 = sst [smem:[#allocation12_spill]] %s3256_s26  ;;  %p594_p10 = scmp.lt.s32.totalorder (!%p540_p9), %s2553_s1, 3 }
  0x1c   : > { %543 = sbr.rel (%p540_p9) target bundleno = 1258 (0x4ea), region = 96  ;;  %s3258_s29 = sld [smem:[#allocation15_spill]] (!%p540_p9) }
  0x1d   : > { %s3259_s24 = sld [smem:[#allocation14_spill]] (!%p540_p9) }
  0x1e   : > { %s3260_s7 = sld [smem:[#allocation20_spill]] (!%p540_p9) }
  0x1f   : > { %s3261_s23 = sld [smem:[#allocation13_spill]] (!%p540_p9) }
  0x20   : > { %s3262_s4 = sld [smem:[#allocation17_spill]] (!%p540_p9) }
  0x21   : > { %v2425_v2 = vmov 0   ;;  %s595_s27 = scalar_select %p594_p10, %s2553_s1, 3  ;;  %v1119_v6 = vld [vmem:[%s3214_s8 + $0x18] sm:$0xff]  ;;  %v1118_v7 = vld [vmem:[%s3214_s8 + $0x10] sm:$0xff]  ;;  %v1117_v11 = vld [vmem:[%s3214_s8 + $0x8] sm:$0xff] }
  0x22   : > { %v633_v0 = vld [vmem:[%s3258_s29 + $0x8] sm:$0xff]  ;;  %2352 = vset.pattern.permute.xlu1 %v2425_v2  ;;  %2351 = vset.pattern.permute.xlu0 %v2425_v2  ;;  %v632_v4 = vld [vmem:[%s3258_s29] sm:$0xff]  ;;  %v1152_v10 = vld [vmem:[%s3215_s9 + $0x18] sm:$0xff]  ;;  %s3263_s6 = sld [smem:[#allocation19_spill]] }
  0x23   : > { %v618_v1 = vld [vmem:[%s3259_s24 + $0x8] sm:$0xff]  ;;  %641 = vperm.xlu1 %2352, %v633_v0   ;;  %2353 = vset.pattern.permute.xlu2 %v2425_v2  ;;  %s2135_s28 = sshll.u32 %s595_s27, 2  ;;  %v617_v5 = vld [vmem:[%s3259_s24] sm:$0xff]  ;;  %v1151_v13 = vld [vmem:[%s3215_s9 + $0x10] sm:$0xff]  ;;  %s3268_s22 = sld [smem:[#allocation16_spill]] }
  0x24   : > { %626 = vperm.xlu0 %2351, %v618_v1   ;;  %v1090_v3 = vld [vmem:[%s3260_s7 + $0x18] sm:$0xff]  ;;  %v1089_v8 = vld [vmem:[%s3260_s7 + $0x10] sm:$0xff]  ;;  %v1088_v9 = vld [vmem:[%s3260_s7 + $0x8] sm:$0xff]  ;;  %s3269_s5 = sld [smem:[#allocation18_spill]] }
  0x25   : > { %1108 = vperm.xlu2 %2353, %v1090_v3   ;;  %s2597_s26 = scalar_lea.vmem %s3261_s23, %s2135_s28  ;;  %v1087_v12 = vld [vmem:[%s3260_s7] sm:$0xff]  ;;  %v1150_v15 = vld [vmem:[%s3215_s9 + $0x8] sm:$0xff]  ;;  %v1204_v19 = vld [vmem:[%s3217_s11 + $0x38] sm:$0xff]  ;;  %s3270_s3 = sld [smem:[#allocation8_spill]] }
  0x26   : > { %v1116_v14 = vld [vmem:[%s3214_s8] sm:$0xff]  ;;  %v959_v16 = vld [vmem:[%s3262_s4 + $0x8] sm:$0xff]  ;;  %v1203_v20 = vld [vmem:[%s3217_s11 + $0x30] sm:$0xff]  ;;  %s591_s23 = sand.u32 1, %s2415_s30   ;;  %s3271_s27 = sld [smem:[#allocation21_spill]] }
  0x27   : > { %v1149_v17 = vld [vmem:[%s3215_s9] sm:$0xff]  ;;  %v1202_v24 = vld [vmem:[%s3217_s11 + $0x28] sm:$0xff]  ;;  %v1199_v27 = vld [vmem:[%s3217_s11 + $0x10] sm:$0xff]  ;;  %s2134_s1 = sshll.u32 %s591_s23, 1 }
  0x28   : > { %v958_v18 = vld [vmem:[%s3262_s4] sm:$0xff]  ;;  %v1012_v21 = vld [vmem:[%s3263_s6 + $0x10] sm:$0xff]  ;;  %v1013_v23 = vld [vmem:[%s3263_s6 + $0x18] sm:$0xff]  ;;  %s593_s0 = scalar_lea.vmem [#allocation2], %s2134_s1  ;;  %s2056_s4 = scalar_lea.sflag [#allocation3], %s591_s23 }
  0x29   : > { %v1201_v22 = vld [vmem:[%s3217_s11 + $0x20] sm:$0xff]  ;;  %v1011_v25 = vld [vmem:[%s3263_s6 + $0x8] sm:$0xff]  ;;  %v1200_v29 = vld [vmem:[%s3217_s11 + $0x18] sm:$0xff]  ;;  %s2068_s21 = sshll.u32 %s593_s0, 4  ;;  %s2069_s21 = int_to_ptr.vmem [resolvable:$true] %s2068_s21 }
  0x2a   : > { %v1010_v26 = vld [vmem:[%s3263_s6] sm:$0xff]  ;;  %v1198_v30 = vld [vmem:[%s3217_s11 + $0x8] sm:$0xff]  ;;  %v1615_v31 = vld [vmem:[%s3220_s14 + $0x78] sm:$0xff] }
  0x2b   : > { %636 = vperm.xlu1 %2352, %v632_v4   ;;  %v1197_v28 = vld [vmem:[%s3217_s11] sm:$0xff]  ;;  %v1614_v32 = vld [vmem:[%s3220_s14 + $0x70] sm:$0xff]  ;;  %v1613_v34 = vld [vmem:[%s3220_s14 + $0x68] sm:$0xff] }
  0x2c   : > { %621 = vperm.xlu0 %2351, %v617_v5   ;;  %v1610_v33 = vld [vmem:[%s3220_s14 + $0x50] sm:$0xff]  ;;  %v1612_v35 = vld [vmem:[%s3220_s14 + $0x60] sm:$0xff]  ;;  %v1609_v36 = vld [vmem:[%s3220_s14 + $0x48] sm:$0xff]  ;;  %s2381_s25 = scalar_lea.hbm %s3271_s27, 8 }
  0x2d   : > { %1137 = vperm.xlu2 %2353, %v1119_v6   ;;  %v1608_v37 = vld [vmem:[%s3220_s14 + $0x40] sm:$0xff]  ;;  %v1611_v38 = vld [vmem:[%s3220_s14 + $0x58] sm:$0xff]  ;;  %v1606_v41 = vld [vmem:[%s3220_s14 + $0x30] sm:$0xff] }
  0x2e   : > { %v1604_v39 = vld [vmem:[%s3220_s14 + $0x20] sm:$0xff]  ;;  %v1607_v40 = vld [vmem:[%s3220_s14 + $0x38] sm:$0xff]  ;;  %v1602_v43 = vld [vmem:[%s3220_s14 + $0x10] sm:$0xff] }
  0x2f   : > { %v1603_v42 = vld [vmem:[%s3220_s14 + $0x18] sm:$0xff]  ;;  %v1605_v44 = vld [vmem:[%s3220_s14 + $0x28] sm:$0xff]  ;;  %v2355_v45 = vld [vmem:[%s2597_s26 + $0x2] ss:$0 sm:$0xff] }
  0x30   : > { %v1799_v50 = vld [vmem:[%s3222_s16 + $0x78] sm:$0xff]  ;;  %v1601_v51 = vld [vmem:[%s3220_s14 + $0x8] sm:$0xff]  ;;  %v1600_v52 = vld [vmem:[%s3220_s14] sm:$0xff] }
  0x31   : > { %v1796_v63 = vld [vmem:[%s3222_s16 + $0x60] sm:$0xff]  ;;  %v1797_v0 = vld [vmem:[%s3222_s16 + $0x68] sm:$0xff]  ;;  %v1798_v1 = vld [vmem:[%s3222_s16 + $0x70] sm:$0xff] }
  0x33   : > { %1132 = vperm.xlu1 %2352, %v1118_v7  }
  0x34   : > { %1103 = vperm.xlu0 %2351, %v1089_v8  }
  0x35   : > { %1098 = vperm.xlu2 %2353, %v1088_v9  }
  0x3b   : > { %1170 = vperm.xlu1 %2352, %v1152_v10  }
  0x3c   : > { %1127 = vperm.xlu0 %2351, %v1117_v11   ;;  %v2426_v11 = vmov 683565275  }
  0x3d   : > { %1093 = vperm.xlu2 %2353, %v1087_v12  }
  0x43   : > { %1165 = vperm.xlu1 %2352, %v1151_v13  }
  0x44   : > { %1122 = vperm.xlu0 %2351, %v1116_v14  }
  0x45   : > { %1160 = vperm.xlu2 %2353, %v1150_v15   ;;  %v1793_v15 = vld [vmem:[%s3222_s16 + $0x48] sm:$0xff] }
  0x4b   : > { %967 = vperm.xlu1 %2352, %v959_v16   ;;  %v1794_v16 = vld [vmem:[%s3222_s16 + $0x50] sm:$0xff] }
  0x4c   : > { %1155 = vperm.xlu0 %2351, %v1149_v17   ;;  %v2427_v17 = vmov 2475754826  }
  0x4d   : > { %962 = vperm.xlu2 %2353, %v958_v18  }
  0x53   : > { %1242 = vperm.xlu1 %2352, %v1204_v19  }
  0x54   : > { %1237 = vperm.xlu0 %2351, %v1203_v20   ;;  %v2428_v20 = vmov 2131351028  }
  0x55   : > { %1026 = vperm.xlu2 %2353, %v1012_v21  }
  0x5b   : > { %1227 = vperm.xlu1 %2352, %v1201_v22   ;;  %v1795_v22 = vld [vmem:[%s3222_s16 + $0x58] sm:$0xff] }
  0x5c   : > { %1031 = vperm.xlu0 %2351, %v1013_v23  }
  0x5d   : > { %1232 = vperm.xlu2 %2353, %v1202_v24   ;;  %v2429_v24 = vmov 2102212464  }
  0x63   : > { %1021 = vperm.xlu1 %2352, %v1011_v25  }
  0x64   : > { %1016 = vperm.xlu0 %2351, %v1010_v26  }
  0x65   : > { %1217 = vperm.xlu2 %2353, %v1199_v27   ;;  %v2430_v27 = vmov 920167782  }
  0x6b   : > { %1207 = vperm.xlu1 %2352, %v1197_v28  }
  0x6c   : > { %1222 = vperm.xlu0 %2351, %v1200_v29  }
  0x6d   : > { %1212 = vperm.xlu2 %2353, %v1198_v30  }
  0x73   : > { %1693 = vperm.xlu1 %2352, %v1615_v31   ;;  %v2431_v31 = vmov 1326507024  }
  0x74   : > { %1688 = vperm.xlu0 %2351, %v1614_v32  }
  0x75   : > { %1678 = vperm.xlu2 %2353, %v1612_v35  }
  0x7b   : > { %1668 = vperm.xlu1 %2352, %v1610_v33  }
  0x7c   : > { %1683 = vperm.xlu0 %2351, %v1613_v34  }
  0x7d   : > { %1673 = vperm.xlu2 %2353, %v1611_v38  }
  0x83   : > { %1663 = vperm.xlu1 %2352, %v1609_v36  }
  0x84   : > { %1658 = vperm.xlu0 %2351, %v1608_v37  }
  0x85   : > { %1648 = vperm.xlu2 %2353, %v1606_v41  }
  0x8b   : > { %1638 = vperm.xlu1 %2352, %v1604_v39  }
  0x8c   : > { %1653 = vperm.xlu0 %2351, %v1607_v40  }
  0x8d   : > { %1643 = vperm.xlu2 %2353, %v1605_v44  }
  0x93   : > { %1633 = vperm.xlu1 %2352, %v1603_v42  }
  0x94   : > { %1628 = vperm.xlu0 %2351, %v1602_v43  }
  0x95   : > { %v642_v46 = vpop.permute.xlu1 %641  ;;  %1618 = vperm.xlu2 %2353, %v1600_v52  }
  0x96   : > { %v627_v47 = vpop.permute.xlu0 %626 }
  0x97   : > { %v631_v48 = vmul.f32 %v2355_v45, %v627_v47  ;;  %v1790_v47 = vld [vmem:[%s3222_s16 + $0x30] sm:$0xff] }
  0x99   : > { %v2723_v49 = vadd.f32 %v642_v46, %v631_v48  ;;  %v1791_v48 = vld [vmem:[%s3222_s16 + $0x38] sm:$0xff] }
  0x9b   : > { %v804_v53 = vand.u32 2139095040, %v2723_v49  ;;  %1877 = vperm.xlu1 %2352, %v1799_v50   ;;  %v801_v54 = vand.u32 2147483647, %v2723_v49 }
  0x9c   : > { %1623 = vperm.xlu0 %2351, %v1601_v51  }
  0x9d   : > { %v805_v55 = vshrl.u32 %v804_v53, 23  ;;  %v637_v59 = vpop.permute.xlu1 %636  ;;  %v808_v60 = vand.u32 8388607, %v801_v54  ;;  %1872 = vperm.xlu2 %2353, %v1798_v1  }
  0x9e   : > { %v622_v56 = vpop.permute.xlu0 %621 }
  0x9f   : > { %v2140_v57 = vadd.s32 4294967169, %v805_v55  ;;  %v630_v58 = vmul.f32 %v2355_v45, %v622_v56  ;;  %v809_v5 = vor.u32 8388608, %v808_v60  ;;  %v1792_v55 = vld [vmem:[%s3222_s16 + $0x40] sm:$0xff] }
  0xa1   : > { %v811_v61 = vadd.s32 1, %v2140_v57  ;;  %v2738_v62 = vadd.f32 %v637_v59, %v630_v58  ;;  %v2753_v13 = vshll.u32 %v809_v5, 8 }
  0xa3   : > { %vm812_vm0 = vcmp.gt.s32.totalorder %v811_v61, 0  ;;  %v649_v3 = vand.u32 2139095040, %v2738_v62  ;;  %1862 = vperm.xlu1 %2352, %v1796_v63   ;;  %v850_v39 = vand.u32 65535, %v2753_v13  ;;  %v851_v40 = vshrl.u32 %v2753_v13, 16 }
  0xa4   : > { %v813_v4 = vsel %vm812_vm0, %v811_v61, 0  ;;  %1867 = vperm.xlu0 %2351, %v1797_v0   ;;  %v646_v52 = vand.u32 2147483647, %v2738_v62 }
  0xa5   : > { %v815_v6 = vand.u32 31, %v813_v4  ;;  %v650_v7 = vshrl.u32 %v649_v3, 23  ;;  %v2750_v10 = vshrl.u32 %v813_v4, 5  ;;  %1857 = vperm.xlu2 %2353, %v1795_v22   ;;  %v1788_v22 = vld [vmem:[%s3222_s16 + $0x20] sm:$0xff] }
  0xa6   : > { %v2813_v4 = vand.u32 8388607, %v646_v52 }
  0xa7   : > { %v816_v8 = vsub.s32 32, %v815_v6  ;;  %v2137_v9 = vadd.s32 4294967169, %v650_v7  ;;  %v818_v12 = vshll.u32 %v2426_v11, %v815_v6  ;;  %v821_v19 = vshll.u32 %v2427_v17, %v815_v6 }
  0xa8   : > { %v824_v21 = vshll.u32 %v2428_v20, %v815_v6  ;;  %v827_v26 = vshll.u32 %v2429_v24, %v815_v6  ;;  %v830_v30 = vshll.u32 %v2430_v27, %v815_v6  ;;  %vm833_vm2 = vcmp.lt.s32.totalorder %v2750_v10, 1 }
  0xa9   : > { %v656_v14 = vadd.s32 1, %v2137_v9  ;;  %v819_v18 = vshrl.u32 %v2427_v17, %v816_v8  ;;  %v822_v23 = vshrl.u32 %v2428_v20, %v816_v8  ;;  %v825_v25 = vshrl.u32 %v2429_v24, %v816_v8 }
  0xaa   : > { %v828_v28 = vshrl.u32 %v2430_v27, %v816_v8  ;;  %v831_v32 = vshrl.u32 %v2431_v31, %v816_v8  ;;  %v817_v41 = vshrl.u32 %v2426_v11, %v816_v8  ;;  %vm835_vm3 = vcmp.lt.s32.totalorder %v2750_v10, 3 }
  0xab   : > { %vm657_vm1 = vcmp.gt.s32.totalorder %v656_v14, 0  ;;  %v820_v29 = vor.u32 %v819_v18, %v818_v12  ;;  %1847 = vperm.xlu1 %2352, %v1793_v15   ;;  %v823_v34 = vor.u32 %v822_v23, %v821_v19  ;;  %v826_v35 = vor.u32 %v825_v25, %v824_v21 }
  0xac   : > { %v658_v33 = vsel %vm657_vm1, %v656_v14, 0  ;;  %1852 = vperm.xlu0 %2351, %v1794_v16   ;;  %v829_v36 = vor.u32 %v828_v28, %v827_v26  ;;  %v832_v37 = vor.u32 %v831_v32, %v830_v30  ;;  %vm836_vm4 = vcmp.lt.s32.totalorder %v2750_v10, 4  ;;  %v1789_v28 = vld [vmem:[%s3222_s16 + $0x28] sm:$0xff] }
  0xad   : > { %v2773_v38 = vand.u32 31, %v658_v33  ;;  %v841_v42 = vsel %vm833_vm2, %v820_v29, %v823_v34  ;;  %v838_v43 = vsel %vm836_vm4, %v826_v35, 2102212464  ;;  %v845_v45 = vsel %vm833_vm2, %v823_v34, %v826_v35  ;;  %1842 = vperm.xlu2 %2353, %v1792_v55  }
  0xae   : > { %v842_v44 = vsel %vm836_vm4, %v829_v36, 920167782  ;;  %v846_v46 = vsel %vm836_vm4, %v832_v37, 1326507024  ;;  %vm834_vm5 = vcmp.lt.s32.totalorder %v2750_v10, 2  ;;  %v837_v56 = vsel %vm833_vm2, %v817_v41, %v820_v29  ;;  %v1787_v10 = vld [vmem:[%s3222_s16 + $0x18] sm:$0xff] }
  0xaf   : > { %v843_v50 = vsel %vm835_vm3, %v826_v35, %v842_v44  ;;  %v847_v51 = vsel %vm835_vm3, %v829_v36, %v846_v46  ;;  %v2798_v53 = vsub.s32 32, %v2773_v38  ;;  %v839_v59 = vsel %vm835_vm3, %v823_v34, %v838_v43 }
  0xb0   : > { %v844_v57 = vsel %vm834_vm5, %v841_v42, %v843_v50  ;;  %v848_v58 = vsel %vm834_vm5, %v845_v45, %v847_v51  ;;  %v2815_v5 = vshrl.u32 %v658_v33, 5  ;;  %v2819_v6 = vsel %vm834_vm5, %v837_v56, %v839_v59  ;;  %v1784_v59 = vld [vmem:[%s3222_s16] sm:$0xff] }
  0xb1   : > { %v852_v60 = vand.u32 65535, %v848_v58  ;;  %v853_v61 = vshrl.u32 %v848_v58, 16  ;;  %v874_v63 = vand.u32 65535, %v844_v57  ;;  %v875_v0 = vshrl.u32 %v844_v57, 16 }
  0xb2   : > { %v663_v14 = vshll.u32 %v2426_v11, %v2773_v38  ;;  %v664_v15 = vshrl.u32 %v2427_v17, %v2798_v53  ;;  %v667_v43 = vshrl.u32 %v2428_v20, %v2798_v53  ;;  %v666_v46 = vshll.u32 %v2427_v17, %v2773_v38 }
  0xb3   : > { %1832 = vperm.xlu1 %2352, %v1790_v47   ;;  %v855_v1 = vmul.u32 %v853_v61, %v850_v39  ;;  %v856_v3 = vmul.u32 %v852_v60, %v851_v40  ;;  %v877_v7 = vmul.u32 %v875_v0, %v850_v39  ;;  %v878_v8 = vmul.u32 %v874_v63, %v851_v40 }
  0xb4   : > { %1837 = vperm.xlu0 %2351, %v1791_v48   ;;  %v854_v9 = vmul.u32 %v852_v60, %v850_v39  ;;  %v857_v16 = vmul.u32 %v853_v61, %v851_v40  ;;  %v876_v18 = vmul.u32 %v874_v63, %v850_v39  ;;  %v879_v19 = vmul.u32 %v875_v0, %v851_v40 }
  0xb5   : > { %v858_v12 = vshll.u32 %v855_v1, 16  ;;  %v880_v21 = vshll.u32 %v877_v7, 16  ;;  %v859_v23 = vshrl.u32 %v855_v1, 16  ;;  %v860_v25 = vshll.u32 %v856_v3, 16  ;;  %1827 = vperm.xlu2 %2353, %v1789_v28   ;;  %v2026_v28 = vld [vmem:[%s3224_s18] sm:$0x3] }
  0xb6   : > { %v882_v30 = vshll.u32 %v878_v8, 16  ;;  %v861_v33 = vshrl.u32 %v856_v3, 16  ;;  %v881_v37 = vshrl.u32 %v877_v7, 16  ;;  %v883_v41 = vshrl.u32 %v878_v8, 16 }
  0xb7   : > { %vm862_vm6 = vc.u32 %v854_v9, %v858_v12  ;;  %v864_v26 = vadd.s32 %v858_v12, %v854_v9  ;;  %vm884_vm7 = vc.u32 %v876_v18, %v880_v21  ;;  %v886_v32 = vadd.s32 %v880_v21, %v876_v18 }
  0xb8   : > { %v863_v29 = vsel %vm862_vm6, 1, %v2425_v2  ;;  %v885_v35 = vsel %vm884_vm7, 1, %v2425_v2  ;;  %v2840_v45 = vor.u32 %v664_v15, %v663_v14  ;;  %v670_v47 = vshrl.u32 %v2429_v24, %v2798_v53 }
  0xb9   : > { %v865_v34 = vadd.s32 %v863_v29, %v857_v16  ;;  %vm866_vm8 = vc.u32 %v864_v26, %v860_v25  ;;  %v887_v39 = vadd.s32 %v885_v35, %v879_v19  ;;  %vm888_vm9 = vc.u32 %v886_v32, %v882_v30 }
  0xba   : > { %v867_v36 = vsel %vm866_vm8, 1, %v2425_v2  ;;  %v889_v42 = vsel %vm888_vm9, 1, %v2425_v2  ;;  %v669_v50 = vshll.u32 %v2428_v20, %v2773_v38  ;;  %v672_v51 = vshll.u32 %v2429_v24, %v2773_v38  ;;  %v1785_v20 = vld [vmem:[%s3222_s16 + $0x8] sm:$0xff] }
  0xbb   : > { %1817 = vperm.xlu1 %2352, %v1787_v10   ;;  %v869_v40 = vadd.s32 %v867_v36, %v865_v34  ;;  %v891_v44 = vadd.s32 %v889_v42, %v887_v39  ;;  %v673_v55 = vshrl.u32 %v2430_v27, %v2798_v53  ;;  %v2852_v57 = vor.u32 %v667_v43, %v666_v46 }
  0xbc   : > { %1822 = vperm.xlu0 %2351, %v1788_v22   ;;  %v675_v58 = vshll.u32 %v2430_v27, %v2773_v38  ;;  %v676_v17 = vshrl.u32 %v2431_v31, %v2798_v53  ;;  %v2866_v60 = vadd.s32 %v886_v32, %v882_v30  ;;  %v2868_v61 = vor.u32 %v670_v47, %v669_v50  ;;  %v1786_v27 = vld [vmem:[%s3222_s16 + $0x10] sm:$0xff] }
  0xbd   : > { %v870_v48 = vadd.s32 %v869_v40, %v859_v23  ;;  %v892_v56 = vadd.s32 %v891_v44, %v881_v37  ;;  %v674_v63 = vor.u32 %v673_v55, %v672_v51  ;;  %v654_v38 = vor.u32 8388608, %v2813_v4  ;;  %1812 = vperm.xlu2 %2353, %v1786_v27  }
  0xbe   : > { %v677_v0 = vor.u32 %v676_v17, %v675_v58  ;;  %v894_v1 = vmul.u32 %v2753_v13, %v2819_v6  ;;  %vm678_vm11 = vcmp.lt.s32.totalorder %v2815_v5, 1  ;;  %vm681_vm12 = vcmp.lt.s32.totalorder %v2815_v5, 4 }
  0xbf   : > { %v2864_v24 = vadd.s32 %v870_v48, %v861_v33  ;;  %v893_v31 = vadd.s32 %v892_v56, %v883_v41  ;;  %vm680_vm13 = vcmp.lt.s32.totalorder %v2815_v5, 3  ;;  %v686_v4 = vsel %vm678_vm11, %v2840_v45, %v2852_v57 }
  0xc0   : > { %v687_v13 = vsel %vm681_vm12, %v674_v63, 920167782  ;;  %vm679_vm14 = vcmp.lt.s32.totalorder %v2815_v5, 2  ;;  %v690_v7 = vsel %vm678_vm11, %v2852_v57, %v2868_v61  ;;  %v691_v8 = vsel %vm681_vm12, %v677_v0, 1326507024 }
  0xc1   : > { %vm896_vm10 = vc.u32 %v2864_v24, %v2866_v60  ;;  %v897_v3 = vadd.s32 1, %v893_v31  ;;  %v688_v6 = vsel %vm680_vm13, %v2868_v61, %v687_v13  ;;  %v692_v14 = vsel %vm680_vm13, %v674_v63, %v691_v8 }
  0xc2   : > { %v689_v12 = vsel %vm679_vm14, %v686_v4, %v688_v6  ;;  %v2901_v15 = vshll.u32 %v654_v38, 8  ;;  %v693_v18 = vsel %vm679_vm14, %v690_v7, %v692_v14  ;;  %v662_v0 = vshrl.u32 %v2426_v11, %v2798_v53 }
  0xc3   : > { %1802 = vperm.xlu1 %2352, %v1784_v59   ;;  %v898_v9 = vsel %vm896_vm10, %v897_v3, %v893_v31  ;;  %v720_v19 = vshrl.u32 %v689_v12, 16  ;;  %v697_v22 = vand.u32 65535, %v693_v18  ;;  %v698_v23 = vshrl.u32 %v693_v18, 16 }
  0xc4   : > { %1807 = vperm.xlu0 %2351, %v1785_v20   ;;  %v899_v16 = vadd.s32 %v898_v9, %v894_v1  ;;  %v695_v21 = vand.u32 65535, %v2901_v15  ;;  %v696_v10 = vshrl.u32 %v2901_v15, 16  ;;  %v719_v26 = vand.u32 65535, %v689_v12 }
  0xc5   : > { %2029 = vperm.xlu2 %2353, %v2026_v28   ;;  %v683_v31 = vsel %vm681_vm12, %v2868_v61, 2102212464  ;;  %v682_v7 = vsel %vm678_vm11, %v662_v0, %v2840_v45  ;;  %v895_v11 = vadd.s32 %v2866_v60, %v2864_v24  ;;  %vm803_vm6 = vcmp.lt.s32.totalorder %v2723_v49, 0 }
  0xc6   : > { %v900_v25 = vadd.s32 536870912, %v899_v16  ;;  %v700_v29 = vmul.u32 %v698_v23, %v695_v21  ;;  %v701_v30 = vmul.u32 %v697_v22, %v696_v10  ;;  %v722_v33 = vmul.u32 %v720_v19, %v695_v21 }
  0xc7   : > { %v699_v34 = vmul.u32 %v697_v22, %v695_v21  ;;  %v702_v37 = vmul.u32 %v698_v23, %v696_v10  ;;  %v721_v39 = vmul.u32 %v719_v26, %v695_v21  ;;  %v723_v43 = vmul.u32 %v719_v26, %v696_v10 }
  0xc8   : > { %v2910_v32 = vshrl.u32 %v900_v25, 30  ;;  %v703_v35 = vshll.u32 %v700_v29, 16  ;;  %v725_v40 = vshll.u32 %v722_v33, 16  ;;  %v705_v41 = vshll.u32 %v701_v30, 16 }
  0xc9   : > { %v704_v47 = vshrl.u32 %v700_v29, 16  ;;  %v724_v55 = vmul.u32 %v720_v19, %v696_v10  ;;  %v727_v58 = vshll.u32 %v723_v43, 16  ;;  %v706_v1 = vshrl.u32 %v701_v30, 16 }
  0xca   : > { %v902_v36 = vshll.u32 %v2910_v32, 30  ;;  %vm707_vm15 = vc.u32 %v699_v34, %v703_v35  ;;  %v709_v42 = vadd.s32 %v703_v35, %v699_v34  ;;  %vm729_vm1 = vc.u32 %v721_v39, %v725_v40 }
  0xcb   : > { %v708_v46 = vsel %vm707_vm15, 1, %v2425_v2  ;;  %v730_v17 = vsel %vm729_vm1, 1, %v2425_v2  ;;  %v731_v59 = vadd.s32 %v725_v40, %v721_v39  ;;  %v726_v13 = vshrl.u32 %v722_v33, 16  ;;  %v2943_v39 = vpop.permute.xlu2 %1108 }
  0xcc   : > { %v903_v44 = vsub.s32 %v899_v16, %v902_v36  ;;  %v710_v48 = vadd.s32 %v708_v46, %v702_v37  ;;  %vm711_vm0 = vc.u32 %v709_v42, %v705_v41  ;;  %v732_v63 = vadd.s32 %v730_v17, %v724_v55 }
  0xcd   : > { %v712_v51 = vsel %vm711_vm0, 1, %v2425_v2  ;;  %vm733_vm3 = vc.u32 %v731_v59, %v727_v58  ;;  %v684_v8 = vsel %vm680_vm13, %v2852_v57, %v683_v31  ;;  %v728_v9 = vshrl.u32 %v723_v43, 16 }
  0xce   : > { %vm904_vm2 = vcmp.lt.s32.totalorder %v903_v44, 0  ;;  %v905_v50 = vsub.s32 0, %v903_v44  ;;  %v714_v56 = vadd.s32 %v712_v51, %v710_v48  ;;  %v734_v3 = vsel %vm733_vm3, 1, %v2425_v2 }
  0xcf   : > { %v736_v6 = vadd.s32 %v734_v3, %v732_v63  ;;  %v735_v2 = vadd.s32 %v731_v59, %v727_v58  ;;  %v685_v18 = vsel %vm679_vm14, %v682_v7, %v684_v8  ;;  %vm2939_vm7 = vcmp.le.f32.partialorder %v801_v54, 0.7853982  ;;  %v1104_v7 = vpop.permute.xlu0 %1103 }
  0xd0   : > { %v906_v20 = vsel %vm904_vm2, %v905_v50, %v903_v44  ;;  %v715_v38 = vadd.s32 %v714_v56, %v704_v47  ;;  %v739_v22 = vmul.u32 %v2901_v15, %v685_v18  ;;  %v925_v40 = vsub.s32 4, %v2910_v32 }
  0xd1   : > { %v907_v27 = vclz %v906_v20  ;;  %v737_v12 = vadd.s32 %v736_v6, %v726_v13  ;;  %vm944_vm13 = vweird.f32 %v2723_v49  ;;  %vm648_vm14 = vcmp.lt.s32.totalorder %v2738_v62, 0 }
  0xd2   : > { %v716_v61 = vadd.s32 %v715_v38, %v706_v1  ;;  %v926_v54 = vsel %vm803_vm6, %v925_v40, %v2910_v32  ;;  %vm2956_vm15 = vcmp.le.f32.partialorder %v646_v52, 0.7853982  ;;  %vm789_vm3 = vweird.f32 %v2738_v62 }
  0xd3   : > { %v2141_v4 = vadd.s32 4294967294, %v907_v27  ;;  %v738_v19 = vadd.s32 %v737_v12, %v728_v9  ;;  %v928_v56 = vsel %vm2939_vm7, 0, %v926_v54  ;;  %v1138_v38 = vpop.permute.xlu2 %1137 }
  0xd4   : > { %vm741_vm5 = vc.u32 %v716_v61, %v735_v2  ;;  %v740_v27 = vadd.s32 %v735_v2, %v716_v61  ;;  %v945_v0 = vadd.s32 3, %v928_v56 }
  0xd5   : > { %vm2142_vm4 = vcmp.lt.s32.totalorder %v2141_v4, 0  ;;  %v742_v57 = vadd.s32 1, %v738_v19 }
  0xd6   : > { %v910_v53 = vsel %vm2142_vm4, 0, %v2141_v4  ;;  %v946_v12 = vand.u32 3, %v945_v0  ;;  %vm970_vm4 = vcmask 130048  }
  0xd7   : > { %v911_v14 = vsub.s32 32, %v910_v53  ;;  %v915_v16 = vsub.s32 4294967266, %v910_v53  ;;  %v912_v45 = vshll.u32 %v903_v44, %v910_v53  ;;  %v743_v26 = vsel %vm741_vm5, %v742_v57, %v738_v19 }
  0xd8   : > { %v744_v28 = vadd.s32 %v743_v26, %v739_v22  ;;  %vm948_vm10 = vcmp.eq.s32.totalorder %v946_v12, 0  ;;  %vm951_vm11 = vcmp.eq.s32.totalorder %v946_v12, 2  ;;  %vm947_vm12 = vcmp.lt.s32.totalorder %v946_v12, 2 }
  0xd9   : > { %v913_v21 = vshrl.u32 %v895_v11, %v911_v14  ;;  %v916_v10 = vadd.s32 127, %v915_v16 }
  0xda   : > { %v745_v60 = vadd.s32 536870912, %v744_v28 }
  0xdb   : > { %v914_v23 = vor.u32 %v913_v21, %v912_v45  ;;  %v917_v25 = vshll.u32 %v916_v10, 23  ;;  %v1133_v45 = vpop.permute.xlu1 %1132  ;;  %v1099_v57 = vpop.permute.xlu2 %1098 }
  0xdc   : > { %v2933_v33 = vshrl.u32 %v745_v60, 30 }
  0xdd   : > { %v918_v24 = vor.u32 4788187, %v917_v25  ;;  %v921_v30 = vcvt.s32.f32 %v914_v23 }
  0xde   : > { %v747_v34 = vshll.u32 %v2933_v33, 30 }
  0xdf   : > { %v919_v29 = vand.u32 2147483647, %v918_v24  ;;  %v1191_v24 = vld [vmem:[%s3216_s10 + $0x10] sm:$0xff] }
  0xe0   : > { %v748_v36 = vsub.s32 %v744_v28, %v747_v34  ;;  %v1128_v28 = vpop.permute.xlu0 %1127 }
  0xe1   : > { %v922_v5 = vmul.f32 %v921_v30, %v919_v29  ;;  %v770_v29 = vsub.s32 4, %v2933_v33 }
  0xe2   : > { %vm749_vm8 = vcmp.lt.s32.totalorder %v748_v36, 0  ;;  %v750_v42 = vsub.s32 0, %v748_v36 }
  0xe3   : > { %v923_v35 = vxor.u32 2147483648, %v922_v5  ;;  %v1171_v15 = vpop.permute.xlu1 %1170  ;;  %v1094_v40 = vpop.permute.xlu2 %1093 }
  0xe4   : > { %v751_v44 = vsel %vm749_vm8, %v750_v42, %v748_v36 }
  0xe5   : > { %v924_v37 = vsel %vm803_vm6, %v923_v35, %v922_v5  ;;  %v752_v48 = vclz %v751_v44  ;;  %v2354_v35 = vld [vmem:[%s2597_s26] ss:$0 sm:$0xff] }
  0xe6   : > { %v927_v41 = vsel %vm2939_vm7, %v2723_v49, %v924_v37  ;;  %v771_v37 = vsel %vm648_vm14, %v770_v29, %v2933_v33  ;;  %v1115_v42 = vmul.f32 %v2354_v35, %v2943_v39  ;;  %v1114_v33 = vmul.f32 %v2354_v35, %v1104_v7  ;;  %v1193_v29 = vld [vmem:[%s3216_s10 + $0x20] sm:$0xff] }
  0xe7   : > { %v929_v43 = vmul.f32 %v927_v41, %v927_v41  ;;  %v2138_v55 = vadd.s32 4294967294, %v752_v48  ;;  %v773_v44 = vsel %vm2956_vm15, 0, %v771_v37  ;;  %v1112_v39 = vmul.f32 %v2354_v35, %v1094_v40 }
  0xe8   : > { %v1123_v48 = vpop.permute.xlu0 %1122 }
  0xe9   : > { %v930_v46 = vmul.f32 -0.001358992, %v929_v43  ;;  %v937_v47 = vmul.f32 -0.00019511016, %v929_v43  ;;  %vm2139_vm9 = vcmp.lt.s32.totalorder %v2138_v55, 0 }
  0xea   : > { %v755_v59 = vsel %vm2139_vm9, 0, %v2138_v55  ;;  %vm1245_vm9 = vcmask 261120  }
  0xeb   : > { %v931_v50 = vadd.f32 0.041655596, %v930_v46  ;;  %v938_v51 = vadd.f32 0.008332121, %v937_v47  ;;  %v756_v31 = vsub.s32 32, %v755_v59  ;;  %v760_v1 = vsub.s32 4294967266, %v755_v59 }
  0xec   : > { %v757_v13 = vshll.u32 %v748_v36, %v755_v59  ;;  %v2356_v36 = vld [vmem:[%s2597_s26 + $0x1] ss:$0 sm:$0xff] }
  0xed   : > { %v932_v58 = vmul.f32 %v931_v50, %v929_v43  ;;  %v939_v17 = vmul.f32 %v938_v51, %v929_v43  ;;  %v758_v32 = vshrl.u32 %v740_v27, %v756_v31  ;;  %v761_v6 = vadd.s32 127, %v760_v1 }
  0xee   : > { %v1113_v51 = vmul.f32 %v2354_v35, %v1099_v57  ;;  %v1142_v56 = vmul.f32 %v2356_v36, %v1128_v28  ;;  %v1141_v0 = vmul.f32 %v2356_v36, %v1123_v48  ;;  %v1190_v28 = vld [vmem:[%s3216_s10 + $0x8] sm:$0xff] }
  0xef   : > { %v933_v20 = vadd.f32 -0.4999988, %v932_v58  ;;  %v940_v63 = vadd.f32 -0.16666654, %v939_v17  ;;  %v759_v11 = vor.u32 %v758_v32, %v757_v13  ;;  %v762_v53 = vshll.u32 %v761_v6, 23 }
  0xf0   : > { %v790_v58 = vadd.s32 3, %v773_v44  ;;  %v1143_v17 = vmul.f32 %v2356_v36, %v1133_v45  ;;  %v1146_v31 = vadd.f32 %v1142_v56, %v1113_v51  ;;  %v1009_v51 = vld [vmem:[%s3269_s5 + $0x18] sm:$0xff] }
  0xf1   : > { %v934_v3 = vmul.f32 %v933_v20, %v929_v43  ;;  %v941_v4 = vmul.f32 %v940_v63, %v929_v43  ;;  %v763_v18 = vor.u32 4788187, %v762_v53  ;;  %v766_v2 = vcvt.s32.f32 %v759_v11  ;;  %v1156_v11 = vpop.permute.xlu0 %1155 }
  0xf2   : > { %v1144_v43 = vmul.f32 %v2356_v36, %v1138_v38  ;;  %v1166_v38 = vpop.permute.xlu1 %1165  ;;  %v791_v1 = vand.u32 3, %v790_v58  ;;  %v1147_v32 = vadd.f32 %v1143_v17, %v1114_v33  ;;  %v1145_v53 = vadd.f32 %v1141_v0, %v1112_v39 }
  0xf3   : > { %v935_v8 = vadd.f32 1.0, %v934_v3  ;;  %v942_v9 = vadd.f32 1.0, %v941_v4  ;;  %v764_v61 = vand.u32 2147483647, %v763_v18  ;;  %v1161_v4 = vpop.permute.xlu2 %1160 }
  0xf4   : > { %v1148_v55 = vadd.f32 %v1144_v43, %v1115_v42  ;;  %v1174_v12 = vadd.f32 %v1161_v4, %v1146_v31  ;;  %vm793_vm0 = vcmp.eq.s32.totalorder %v791_v1, 0  ;;  %vm796_vm1 = vcmp.eq.s32.totalorder %v791_v1, 2  ;;  %v1006_v43 = vld [vmem:[%s3269_s5] sm:$0xff] }
  0xf5   : > { %v943_v14 = vmul.f32 %v942_v9, %v927_v41  ;;  %v952_v16 = vxor.u32 2147483648, %v935_v8  ;;  %v767_v23 = vmul.f32 %v766_v2, %v764_v61  ;;  %vm792_vm2 = vcmp.lt.s32.totalorder %v791_v1, 2 }
  0xf6   : > { %v1176_v3 = vadd.f32 %v1171_v15, %v1148_v55  ;;  %v1173_v61 = vadd.f32 %v1156_v11, %v1145_v53  ;;  %vm1178_vm7 = vcmp.gt.f32.partialorder %v1174_v12, 0.0 }
  0xf7   : > { %v949_v19 = vxor.u32 2147483648, %v943_v14  ;;  %v953_v10 = vsel %vm951_vm11, %v952_v16, %v943_v14  ;;  %v768_v26 = vxor.u32 2147483648, %v767_v23 }
  0xf8   : > { %v1184_v16 = vmul.f32 0.01, %v1176_v3  ;;  %vm1180_vm5 = vcmp.gt.f32.partialorder %v1176_v3, 0.0  ;;  %vm1177_vm8 = vcmp.gt.f32.partialorder %v1173_v61, 0.0 }
  0xf9   : > { %v950_v21 = vsel %vm948_vm10, %v935_v8, %v949_v19  ;;  %v769_v60 = vsel %vm648_vm14, %v768_v26, %v767_v23  ;;  %v1175_v8 = vadd.f32 %v1166_v38, %v1147_v32  ;;  %v956_v19 = vld [vmem:[%s3268_s22] sm:$0xff]  ;;  %v957_v23 = vld [vmem:[%s3268_s22 + $0x8] sm:$0xff]  ;;  %v1238_v56 = vpop.permute.xlu0 %1237 }
  0xfa   : > { %v954_v22 = vsel %vm947_vm12, %v950_v21, %v953_v10  ;;  %v772_v49 = vsel %vm2956_vm15, %v2738_v62, %v769_v60  ;;  %v1188_v21 = vsel %vm1180_vm5, %v1176_v3, %v1184_v16  ;;  %v1182_v10 = vmul.f32 0.01, %v1174_v12  ;;  %v1189_v26 = vld [vmem:[%s3216_s10] sm:$0xff]  ;;  %v1192_v60 = vld [vmem:[%s3216_s10 + $0x18] sm:$0xff]  ;;  %v968_v15 = vpop.permute.xlu1 %967 }
  0xfb   : > { %v955_v25 = vsel %vm944_vm13, nan, %v954_v22  ;;  %v774_v30 = vmul.f32 %v772_v49, %v772_v49  ;;  %v1183_v45 = vmul.f32 0.01, %v1175_v8  ;;  %vm1179_vm6 = vcmp.gt.f32.partialorder %v1175_v8, 0.0  ;;  %v963_v35 = vpop.permute.xlu2 %962 }
  0xfc   : > { %991 = vmatpush.msra.mxu2 %v955_v25  ;;  %v1181_v62 = vmul.f32 0.01, %v1173_v61  ;;  %v1186_v22 = vsel %vm1178_vm7, %v1174_v12, %v1182_v10 }
  0xfd   : > { %v775_v5 = vmul.f32 -0.001358992, %v774_v30  ;;  %v782_v34 = vmul.f32 -0.00019511016, %v774_v30  ;;  %v1187_v57 = vsel %vm1179_vm6, %v1175_v8, %v1183_v45 }
  0xfe   : > { %v1185_v25 = vsel %vm1177_vm8, %v1173_v61, %v1181_v62 }
  0xff   : > { %v776_v52 = vadd.f32 0.041655596, %v775_v5  ;;  %v783_v41 = vadd.f32 0.008332121, %v782_v34  ;;  %v1196_v5 = vld [vmem:[%s3216_s10 + $0x38] sm:$0xff] }
 0x101   : > { %v777_v46 = vmul.f32 %v776_v52, %v774_v30  ;;  %v784_v47 = vmul.f32 %v783_v41, %v774_v30 }
 0x102   : > { %v1243_v33 = vpop.permute.xlu1 %1242 }
 0x103   : > { %v778_v54 = vadd.f32 -0.4999988, %v777_v46  ;;  %v785_v50 = vadd.f32 -0.16666654, %v784_v47  ;;  %v1007_v47 = vld [vmem:[%s3269_s5 + $0x8] sm:$0xff]  ;;  %v1027_v58 = vpop.permute.xlu2 %1026 }
 0x105   : > { %v779_v59 = vmul.f32 %v778_v54, %v774_v30  ;;  %v786_v20 = vmul.f32 %v785_v50, %v774_v30  ;;  %v1195_v30 = vld [vmem:[%s3216_s10 + $0x30] sm:$0xff] }
 0x106   : > { %v1008_v54 = vld [vmem:[%s3269_s5 + $0x10] sm:$0xff] }
 0x107   : > { %v780_v63 = vadd.f32 1.0, %v779_v59  ;;  %v787_v27 = vadd.f32 1.0, %v786_v20  ;;  %v3027_v59 = vpop.permute.xlu0 %1031 }
 0x109   : > { %v788_v13 = vmul.f32 %v787_v27, %v772_v49  ;;  %v797_v6 = vxor.u32 2147483648, %v780_v63  ;;  %v1194_v49 = vld [vmem:[%s3216_s10 + $0x28] sm:$0xff] }
 0x10a   : > { %v1228_v27 = vpop.permute.xlu1 %1227 }
 0x10b   : > { %v794_v9 = vxor.u32 2147483648, %v788_v13  ;;  %v798_v14 = vsel %vm796_vm1, %v797_v6, %v788_v13 }
 0x10d   : > { %v795_v7 = vsel %vm793_vm0, %v780_v63, %v794_v9  ;;  %v1233_v63 = vpop.permute.xlu2 %1232 }
 0x10e   : > { %v799_v18 = vsel %vm792_vm2, %v795_v7, %v798_v14 }
 0x10f   : > { %v800_v2 = vsel %vm789_vm3, nan, %v799_v18  ;;  %v1017_v39 = vpop.permute.xlu0 %1016 }
 0x110   : > { %992 = vmatpush.msra.mxu2 %v800_v2 }
 0x111   : > { %2143 = vmatmul.msk.f32.vlgmr.msra.gmra.mxu2 %vm970_vm4, %v956_v19 }
 0x112   : > { %1282 = vmatpush.msrb.mxu2 %v1188_v21  ;;  %v1022_v1 = vpop.permute.xlu1 %1021 }
 0x114   : > { %1283 = vmatpush.msrb.mxu2 %v1187_v57 }
 0x115   : > { %v1218_v38 = vpop.permute.xlu2 %1217 }
 0x116   : > { %1284 = vmatpush.msrb.mxu2 %v1186_v22 }
 0x117   : > { %v1223_v8 = vpop.permute.xlu0 %1222 }
 0x118   : > { %1285 = vmatpush.msrb.mxu2 %v1185_v25 }
 0x119   : > { %2144 = vmatmul.msk.f32.gmra.mxu2 %vm970_vm4, %v957_v23 }
 0x11a   : > { %v1208_v21 = vpop.permute.xlu1 %1207 }
 0x11d   : > { %v1213_v18 = vpop.permute.xlu2 %1212 }
 0x121   : > { %2149 = vmatmul.msk.f32.vlgmr.msrb.gmra.mxu2 %vm1245_vm9, %v1189_v26 }
 0x129   : > { %2150 = vmatmul.msk.f32.gmra.mxu2 %vm1245_vm9, %v1190_v28 }
 0x131   : > { %2151 = vmatmul.msk.f32.gmra.mxu2 %vm1245_vm9, %v1191_v24 }
 0x139   : > { %2152 = vmatmul.msk.f32.gmra.mxu2 %vm1245_vm9, %v1192_v60 }
 0x141   : > { %2153 = vmatmul.msk.f32.gmra.mxu2 %vm1245_vm9, %v1193_v29 }
 0x149   : > { %2154 = vmatmul.msk.f32.gmra.mxu2 %vm1245_vm9, %v1194_v49 }
 0x151   : > { %2155 = vmatmul.msk.f32.gmra.mxu2 %vm1245_vm9, %v1195_v30 }
 0x159   : > { %2156 = vmatmul.msk.f32.gmra.mxu2 %vm1245_vm9, %v1196_v5  ;;  %v2273_v5 = vld [vmem:[%s3218_s12] sm:$0xff] }
 0x194   : > { %v994_v34 = vpop.f32.mrf.mxu2 }
 0x195   : > { %v995_v36 = vadd.f32 %v994_v34, %v963_v35 }
 0x197   : > { %v1002_v41 = vmul.f32 0.01, %v995_v36  ;;  %vm1000_vm11 = vcmp.gt.f32.partialorder %v995_v36, 0.0 }
 0x199   : > { %v1004_v44 = vsel %vm1000_vm11, %v995_v36, %v1002_v41  ;;  %v2274_v36 = vld [vmem:[%s3218_s12 + $0x8] sm:$0xff] }
 0x19c   : > { %v997_v37 = vpop.f32.mrf.mxu2 }
 0x19d   : > { %v998_v40 = vadd.f32 %v997_v37, %v968_v15 }
 0x19f   : > { %vm1001_vm10 = vcmp.gt.f32.partialorder %v998_v40, 0.0  ;;  %v1003_v52 = vmul.f32 0.01, %v998_v40 }
 0x1a1   : > { %v1005_v42 = vsel %vm1001_vm10, %v998_v40, %v1003_v52 }
 0x1a2   : > { %1060 = vmatpush.msra.mxu1 %v1005_v42 }
 0x1a4   : > { %1061 = vmatpush.msra.mxu1 %v1004_v44  ;;  %v1287_v46 = vpop.f32.mrf.mxu2 }
 0x1a5   : > { %2145 = vmatmul.msk.f32.vlgmr.msra.gmra.mxu1 %vm970_vm4, %v1006_v43  ;;  %v1288_v10 = vadd.f32 %v1287_v46, %v1208_v21 }
 0x1a7   : > { %v1319_v26 = vmul.f32 0.01, %v1288_v10  ;;  %vm1311_vm3 = vcmp.gt.f32.partialorder %v1288_v10, 0.0 }
 0x1a9   : > { %v1327_v29 = vsel %vm1311_vm3, %v1288_v10, %v1319_v26 }
 0x1ac   : > { %v1290_v48 = vpop.f32.mrf.mxu2 }
 0x1ad   : > { %2146 = vmatmul.msk.f32.gmra.mxu1 %vm970_vm4, %v1007_v47  ;;  %v1291_v61 = vadd.f32 %v1290_v48, %v1213_v18 }
 0x1af   : > { %v1320_v23 = vmul.f32 0.01, %v1291_v61  ;;  %vm1312_vm2 = vcmp.gt.f32.partialorder %v1291_v61, 0.0 }
 0x1b1   : > { %v1328_v60 = vsel %vm1312_vm2, %v1291_v61, %v1320_v23 }
 0x1b2   : > { %v1351_v49 = vpack.c.bf16 %v1328_v60, %v1327_v29 }
 0x1b4   : > { %v1293_v50 = vpop.f32.mrf.mxu2 }
 0x1b5   : > { %2147 = vmatmul.msk.f32.gmra.mxu1 %vm970_vm4, %v1008_v54  ;;  %v1294_v53 = vadd.f32 %v1293_v50, %v1218_v38  ;;  %v2280_v38 = vld [vmem:[%s3218_s12 + $0x38] sm:$0xff] }
 0x1b7   : > { %v1321_v57 = vmul.f32 0.01, %v1294_v53  ;;  %vm1313_vm1 = vcmp.gt.f32.partialorder %v1294_v53, 0.0 }
 0x1b9   : > { %v1329_v28 = vsel %vm1313_vm1, %v1294_v53, %v1321_v57 }
 0x1bc   : > { %v1296_v55 = vpop.f32.mrf.mxu2 }
 0x1bd   : > { %2148 = vmatmul.msk.f32.gmra.mxu1 %vm970_vm4, %v1009_v51  ;;  %v1297_v9 = vadd.f32 %v1296_v55, %v1223_v8  ;;  %vm1526_vm4 = vcmask 523264   ;;  %v2288_v8 = vld [vmem:[%s3219_s13 + $0x38] sm:$0xff] }
 0x1bf   : > { %v1322_v2 = vmul.f32 0.01, %v1297_v9  ;;  %vm1314_vm0 = vcmp.gt.f32.partialorder %v1297_v9, 0.0 }
 0x1c1   : > { %v1330_v25 = vsel %vm1314_vm0, %v1297_v9, %v1322_v2 }
 0x1c2   : > { %v1352_v24 = vpack.c.bf16 %v1330_v25, %v1329_v28 }
 0x1c4   : > { %v1299_v17 = vpop.f32.mrf.mxu2 }
 0x1c5   : > { %v1300_v32 = vadd.f32 %v1299_v17, %v1228_v27  ;;  %v2276_v17 = vld [vmem:[%s3218_s12 + $0x18] sm:$0xff] }
 0x1c6   : > { %v2284_v27 = vld [vmem:[%s3219_s13 + $0x18] sm:$0xff] }
 0x1c7   : > { %v1323_v7 = vmul.f32 0.01, %v1300_v32  ;;  %vm1315_vm15 = vcmp.gt.f32.partialorder %v1300_v32, 0.0 }
 0x1c9   : > { %v1331_v62 = vsel %vm1315_vm15, %v1300_v32, %v1323_v7 }
 0x1cc   : > { %v1302_v20 = vpop.f32.mrf.mxu2 }
 0x1cd   : > { %v1303_v3 = vadd.f32 %v1302_v20, %v1233_v63  ;;  %v2283_v20 = vld [vmem:[%s3219_s13 + $0x10] sm:$0xff]  ;;  %v2278_v63 = vld [vmem:[%s3218_s12 + $0x28] sm:$0xff] }
 0x1cf   : > { %v1324_v12 = vmul.f32 0.01, %v1303_v3  ;;  %vm1316_vm14 = vcmp.gt.f32.partialorder %v1303_v3, 0.0 }
 0x1d1   : > { %v1332_v45 = vsel %vm1316_vm14, %v1303_v3, %v1324_v12  ;;  %v2287_v3 = vld [vmem:[%s3219_s13 + $0x30] sm:$0xff] }
 0x1d2   : > { %v1353_v22 = vpack.c.bf16 %v1332_v45, %v1331_v62 }
 0x1d4   : > { %v1305_v31 = vpop.f32.mrf.mxu2 }
 0x1d5   : > { %v1306_v0 = vadd.f32 %v1305_v31, %v1238_v56  ;;  %v2275_v56 = vld [vmem:[%s3218_s12 + $0x10] sm:$0xff]  ;;  %v2285_v31 = vld [vmem:[%s3219_s13 + $0x20] sm:$0xff] }
 0x1d7   : > { %v1325_v13 = vmul.f32 0.01, %v1306_v0  ;;  %vm1317_vm12 = vcmp.gt.f32.partialorder %v1306_v0, 0.0 }
 0x1d9   : > { %v1333_v14 = vsel %vm1317_vm12, %v1306_v0, %v1325_v13  ;;  %v2286_v0 = vld [vmem:[%s3219_s13 + $0x28] sm:$0xff] }
 0x1dc   : > { %v1308_v4 = vpop.f32.mrf.mxu2 }
 0x1dd   : > { %v1309_v6 = vadd.f32 %v1308_v4, %v1243_v33  ;;  %v2282_v33 = vld [vmem:[%s3219_s13 + $0x8] sm:$0xff]  ;;  %v3092_v4 = vpop.permute.xlu2 %1678 }
 0x1df   : > { %v1326_v11 = vmul.f32 0.01, %v1309_v6  ;;  %vm1318_vm13 = vcmp.gt.f32.partialorder %v1309_v6, 0.0 }
 0x1e1   : > { %v1334_v16 = vsel %vm1318_vm13, %v1309_v6, %v1326_v11  ;;  %v3104_v11 = vpop.permute.xlu1 %1693 }
 0x1e2   : > { %v1354_v19 = vpack.c.bf16 %v1334_v16, %v1333_v14 }
 0x1e4   : > { %1555 = vmatpush.bf16.msra.mxu0 %v1354_v19 }
 0x1e5   : > { %v3096_v6 = vpop.permute.xlu2 %1673 }
 0x1e8   : > { %1556 = vmatpush.bf16.msra.mxu0 %v1353_v22 }
 0x1e9   : > { %v3106_v16 = vpop.permute.xlu1 %1668 }
 0x1ec   : > { %1557 = vmatpush.bf16.msra.mxu0 %v1352_v24 }
 0x1ed   : > { %v1649_v53 = vpop.permute.xlu2 %1648 }
 0x1f0   : > { %1558 = vmatpush.bf16.msra.mxu0 %v1351_v49 }
 0x1f1   : > { %v3108_v21 = vpop.permute.xlu1 %1663 }
 0x1f3   : > { %2229 = vmatmul.msk.bf16.vlgmr.msra.gmra.mxu0 %vm1526_vm4, %v2273_v5 }
 0x1f5   : > { %v1644_v18 = vpop.permute.xlu2 %1643 }
 0x1f9   : > { %v1639_v49 = vpop.permute.xlu1 %1638 }
 0x1fd   : > { %v1619_v10 = vpop.permute.xlu2 %1618 }
 0x203   : > { %2230 = vmatmul.msk.bf16.gmra.mxu0 %vm1526_vm4, %v2274_v36 }
 0x213   : > { %2231 = vmatmul.msk.bf16.gmra.mxu0 %vm1526_vm4, %v2275_v56 }
 0x222   : > { %v1063_v30 = vpop.f32.mrf.mxu1 }
 0x223   : > { %v1064_v52 = vadd.f32 %v1063_v30, %v1017_v39  ;;  %2232 = vmatmul.msk.bf16.gmra.mxu0 %vm1526_vm4, %v2276_v17  ;;  %v2279_v39 = vld [vmem:[%s3218_s12 + $0x30] sm:$0xff] }
 0x225   : > { %v1079_v46 = vmul.f32 0.01, %v1064_v52  ;;  %vm1075_vm8 = vcmp.gt.f32.partialorder %v1064_v52, 0.0 }
 0x227   : > { %v1083_v51 = vsel %vm1075_vm8, %v1064_v52, %v1079_v46 }
 0x22a   : > { %v1066_v34 = vpop.f32.mrf.mxu1 }
 0x22b   : > { %v1067_v37 = vadd.f32 %v1066_v34, %v1022_v1  ;;  %v3086_v1 = vpop.permute.xlu0 %1688 }
 0x22d   : > { %v1080_v43 = vmul.f32 0.01, %v1067_v37  ;;  %vm1076_vm7 = vcmp.gt.f32.partialorder %v1067_v37, 0.0 }
 0x22f   : > { %v1084_v50 = vsel %vm1076_vm7, %v1067_v37, %v1080_v43 }
 0x230   : > { %v1371_v55 = vpack.c.bf16 %v1084_v50, %v1083_v51 }
 0x232   : > { %v1069_v35 = vpop.f32.mrf.mxu1 }
 0x233   : > { %v1070_v15 = vadd.f32 %v1069_v35, %v1027_v58  ;;  %v2281_v58 = vld [vmem:[%s3219_s13] sm:$0xff]  ;;  %v3094_v32 = vpop.permute.xlu0 %1683 }
 0x235   : > { %v1081_v41 = vmul.f32 0.01, %v1070_v15  ;;  %vm1077_vm5 = vcmp.gt.f32.partialorder %v1070_v15, 0.0 }
 0x237   : > { %v1085_v47 = vsel %vm1077_vm5, %v1070_v15, %v1081_v41 }
 0x23a   : > { %v1072_v40 = vpop.f32.mrf.mxu1 }
 0x23b   : > { %v1073_v42 = vadd.f32 %v1072_v40, %v3027_v59  ;;  %v2277_v59 = vld [vmem:[%s3218_s12 + $0x20] sm:$0xff]  ;;  %v3101_v9 = vpop.permute.xlu0 %1658  ;;  %v1634_v40 = vpop.permute.xlu1 %1633 }
 0x23c   : > { %2233 = vmatmul.msk.bf16.gmra.mxu0 %vm1526_vm4, %v2277_v59 }
 0x23d   : > { %v1082_v44 = vmul.f32 0.01, %v1073_v42  ;;  %vm1078_vm6 = vcmp.gt.f32.partialorder %v1073_v42, 0.0 }
 0x23f   : > { %v1086_v48 = vsel %vm1078_vm6, %v1073_v42, %v1082_v44 }
 0x240   : > { %v1372_v54 = vpack.c.bf16 %v1086_v48, %v1085_v47 }
 0x242   : > { %1443 = vmatpush.bf16.msra.mxu3 %v1372_v54 }
 0x243   : > { %v1654_v7 = vpop.permute.xlu0 %1653 }
 0x246   : > { %1444 = vmatpush.bf16.msra.mxu3 %v1371_v55 }
 0x249   : > { %2189 = vmatmul.msk.bf16.vlgmr.msra.gmra.mxu3 %vm1245_vm9, %v2281_v58 }
 0x24b   : > { %v1629_v19 = vpop.permute.xlu0 %1628 }
 0x24c   : > { %2234 = vmatmul.msk.bf16.gmra.mxu0 %vm1526_vm4, %v2278_v63 }
 0x253   : > { %v1624_v23 = vpop.permute.xlu0 %1623 }
 0x259   : > { %2190 = vmatmul.msk.bf16.gmra.mxu3 %vm1245_vm9, %v2282_v33 }
 0x25c   : > { %2235 = vmatmul.msk.bf16.gmra.mxu0 %vm1526_vm4, %v2279_v39 }
 0x269   : > { %2191 = vmatmul.msk.bf16.gmra.mxu3 %vm1245_vm9, %v2283_v20 }
 0x26c   : > { %2236 = vmatmul.msk.bf16.gmra.mxu0 %vm1526_vm4, %v2280_v38 }
 0x270   : > { %v1560_v13 = vpop.f32.mrf.mxu0 }
 0x278   : > { %v1562_v12 = vpop.f32.mrf.mxu0 }
 0x279   : > { %2192 = vmatmul.msk.bf16.gmra.mxu3 %vm1245_vm9, %v2284_v27 }
 0x280   : > { %v1565_v14 = vpop.f32.mrf.mxu0 }
 0x288   : > { %v1567_v2 = vpop.f32.mrf.mxu0 }
 0x289   : > { %2193 = vmatmul.msk.bf16.gmra.mxu3 %vm1245_vm9, %v2285_v31 }
 0x290   : > { %v1570_v25 = vpop.f32.mrf.mxu0 }
 0x298   : > { %v1572_v35 = vpop.f32.mrf.mxu0 }
 0x299   : > { %2194 = vmatmul.msk.bf16.gmra.mxu3 %vm1245_vm9, %v2286_v0 }
 0x2a0   : > { %v1575_v43 = vpop.f32.mrf.mxu0 }
 0x2a8   : > { %v1577_v55 = vpop.f32.mrf.mxu0 }
 0x2a9   : > { %2195 = vmatmul.msk.bf16.gmra.mxu3 %vm1245_vm9, %v2287_v3 }
 0x2b9   : > { %2196 = vmatmul.msk.bf16.gmra.mxu3 %vm1245_vm9, %v2288_v8  ;;  %v1580_v31 = vpop.f32.mrf.mxu0 }
 0x2cc   : > { %v1446_v61 = vpop.f32.mrf.mxu3 }
 0x2cd   : > { %v1561_v45 = vadd.f32 %v1560_v13, %v1446_v61 }
 0x2cf   : > { %v1696_v57 = vadd.f32 %v1619_v10, %v1561_v45 }
 0x2d1   : > { %v1728_v28 = vmul.f32 0.01, %v1696_v57  ;;  %vm1712_vm9 = vcmp.gt.f32.partialorder %v1696_v57, 0.0 }
 0x2d3   : > { %v1744_v60 = vsel %vm1712_vm9, %v1696_v57, %v1728_v28 }
 0x2d4   : > { %v1448_v62 = vpop.f32.mrf.mxu3 }
 0x2d5   : > { %v1563_v22 = vadd.f32 %v1562_v12, %v1448_v62  ;;  %v1582_v12 = vpop.f32.mrf.mxu0 }
 0x2d7   : > { %v1697_v26 = vadd.f32 %v1624_v23, %v1563_v22 }
 0x2d9   : > { %vm1713_vm10 = vcmp.gt.f32.partialorder %v1697_v26, 0.0  ;;  %v1729_v24 = vmul.f32 0.01, %v1697_v26 }
 0x2db   : > { %v1745_v29 = vsel %vm1713_vm10, %v1697_v26, %v1729_v24 }
 0x2dc   : > { %v1451_v30 = vpop.f32.mrf.mxu3  ;;  %v3110_v5 = vpack.c.bf16 %v1745_v29, %v1744_v60 }
 0x2dd   : > { %v1566_v34 = vadd.f32 %v1565_v14, %v1451_v30  ;;  %v1585_v10 = vpop.f32.mrf.mxu0 }
 0x2df   : > { %v1698_v36 = vadd.f32 %v1629_v19, %v1566_v34 }
 0x2e1   : > { %v1730_v41 = vmul.f32 0.01, %v1698_v36  ;;  %vm1714_vm11 = vcmp.gt.f32.partialorder %v1698_v36, 0.0 }
 0x2e3   : > { %v1746_v44 = vsel %vm1714_vm11, %v1698_v36, %v1730_v41 }
 0x2e4   : > { %v1453_v15 = vpop.f32.mrf.mxu3 }
 0x2e5   : > { %v1568_v37 = vadd.f32 %v1567_v2, %v1453_v15  ;;  %v1587_v22 = vpop.f32.mrf.mxu0 }
 0x2e7   : > { %v1699_v52 = vadd.f32 %v1634_v40, %v1568_v37 }
 0x2e9   : > { %vm1715_vm12 = vcmp.gt.f32.partialorder %v1699_v52, 0.0  ;;  %v1731_v42 = vmul.f32 0.01, %v1699_v52 }
 0x2eb   : > { %v1747_v46 = vsel %vm1715_vm12, %v1699_v52, %v1731_v42 }
 0x2ec   : > { %v1456_v47 = vpop.f32.mrf.mxu3  ;;  %v3112_v48 = vpack.c.bf16 %v1747_v46, %v1746_v44 }
 0x2ed   : > { %v1571_v54 = vadd.f32 %v1570_v25, %v1456_v47 }
 0x2ef   : > { %v1700_v50 = vadd.f32 %v1639_v49, %v1571_v54 }
 0x2f1   : > { %v1732_v17 = vmul.f32 0.01, %v1700_v50  ;;  %vm1716_vm13 = vcmp.gt.f32.partialorder %v1700_v50, 0.0 }
 0x2f3   : > { %v1748_v59 = vsel %vm1716_vm13, %v1700_v50, %v1732_v17 }
 0x2f4   : > { %v1458_v51 = vpop.f32.mrf.mxu3 }
 0x2f5   : > { %v1573_v56 = vadd.f32 %v1572_v35, %v1458_v51 }
 0x2f7   : > { %v1701_v58 = vadd.f32 %v1644_v18, %v1573_v56 }
 0x2f9   : > { %vm1717_vm14 = vcmp.gt.f32.partialorder %v1701_v58, 0.0  ;;  %v1733_v33 = vmul.f32 0.01, %v1701_v58 }
 0x2fb   : > { %v1749_v20 = vsel %vm1717_vm14, %v1701_v58, %v1733_v33 }
 0x2fc   : > { %v1461_v63 = vpop.f32.mrf.mxu3  ;;  %v3114_v27 = vpack.c.bf16 %v1749_v20, %v1748_v59 }
 0x2fd   : > { %v1576_v39 = vadd.f32 %v1575_v43, %v1461_v63 }
 0x2ff   : > { %v1702_v38 = vadd.f32 %v1649_v53, %v1576_v39  ;;  %v1590_v53 = vpop.f32.mrf.mxu0 }
 0x301   : > { %v1734_v8 = vmul.f32 0.01, %v1702_v38  ;;  %vm1718_vm15 = vcmp.gt.f32.partialorder %v1702_v38, 0.0 }
 0x303   : > { %v1750_v18 = vsel %vm1718_vm15, %v1702_v38, %v1734_v8  ;;  %v2295_v38 = vld [vmem:[%s3221_s15 + $0x30] sm:$0xff] }
 0x304   : > { %v1463_v0 = vpop.f32.mrf.mxu3 }
 0x305   : > { %v1578_v3 = vadd.f32 %v1577_v55, %v1463_v0  ;;  %v2291_v0 = vld [vmem:[%s3221_s15 + $0x10] sm:$0xff] }
 0x307   : > { %v1703_v13 = vadd.f32 %v1654_v7, %v1578_v3  ;;  %v1592_v26 = vpop.f32.mrf.mxu0  ;;  %v2293_v3 = vld [vmem:[%s3221_s15 + $0x20] sm:$0xff] }
 0x309   : > { %vm1719_vm0 = vcmp.gt.f32.partialorder %v1703_v13, 0.0  ;;  %v1735_v14 = vmul.f32 0.01, %v1703_v13 }
 0x30b   : > { %v1751_v19 = vsel %vm1719_vm0, %v1703_v13, %v1735_v14  ;;  %v2294_v13 = vld [vmem:[%s3221_s15 + $0x28] sm:$0xff] }
 0x30c   : > { %v1466_v61 = vpop.f32.mrf.mxu3  ;;  %v3116_v2 = vpack.c.bf16 %v1751_v19, %v1750_v18 }
 0x30d   : > { %v1581_v45 = vadd.f32 %v1580_v31, %v1466_v61  ;;  %v1878_v61 = vpop.permute.xlu1 %1877 }
 0x30f   : > { %v1595_v28 = vpop.f32.mrf.mxu0 }
 0x314   : > { %v1468_v57 = vpop.f32.mrf.mxu3 }
 0x315   : > { %v1583_v43 = vadd.f32 %v1582_v12, %v1468_v57 }
 0x317   : > { %v1597_v34 = vpop.f32.mrf.mxu0 }
 0x31c   : > { %v1471_v62 = vpop.f32.mrf.mxu3 }
 0x31d   : > { %v1586_v40 = vadd.f32 %v1585_v10, %v1471_v62  ;;  %v1873_v10 = vpop.permute.xlu2 %1872  ;;  %v1868_v62 = vpop.permute.xlu0 %1867 }
 0x324   : > { %v1473_v23 = vpop.f32.mrf.mxu3 }
 0x325   : > { %v1588_v36 = vadd.f32 %v1587_v22, %v1473_v23 }
 0x327   : > { %v1707_v44 = vadd.f32 %v3096_v6, %v1588_v36  ;;  %v1704_v6 = vadd.f32 %v3101_v9, %v1581_v45  ;;  %v2289_v9 = vld [vmem:[%s3221_s15] sm:$0xff] }
 0x329   : > { %vm1723_vm5 = vcmp.gt.f32.partialorder %v1707_v44, 0.0  ;;  %v1736_v20 = vmul.f32 0.01, %v1704_v6  ;;  %vm1720_vm8 = vcmp.gt.f32.partialorder %v1704_v6, 0.0 }
 0x32b   : > { %v1752_v39 = vsel %vm1720_vm8, %v1704_v6, %v1736_v20 }
 0x32c   : > { %v1476_v25 = vpop.f32.mrf.mxu3 }
 0x32d   : > { %v1591_v49 = vadd.f32 %v1590_v53, %v1476_v25  ;;  %v1863_v25 = vpop.permute.xlu1 %1862 }
 0x32f   : > { %v1708_v52 = vadd.f32 %v3092_v4, %v1591_v49  ;;  %v1705_v4 = vadd.f32 %v3108_v21, %v1583_v43 }
 0x331   : > { %vm1724_vm4 = vcmp.gt.f32.partialorder %v1708_v52, 0.0  ;;  %vm1721_vm7 = vcmp.gt.f32.partialorder %v1705_v4, 0.0 }
 0x334   : > { %v1478_v7 = vpop.f32.mrf.mxu3 }
 0x335   : > { %v1593_v29 = vadd.f32 %v1592_v26, %v1478_v7  ;;  %v1848_v43 = vpop.permute.xlu1 %1847 }
 0x337   : > { %v1709_v15 = vadd.f32 %v3094_v32, %v1593_v29  ;;  %v1740_v32 = vmul.f32 0.01, %v1708_v52 }
 0x339   : > { %v1741_v47 = vmul.f32 0.01, %v1709_v15  ;;  %vm1725_vm3 = vcmp.gt.f32.partialorder %v1709_v15, 0.0  ;;  %v1756_v56 = vsel %vm1724_vm4, %v1708_v52, %v1740_v32  ;;  %v1858_v52 = vpop.permute.xlu2 %1857 }
 0x33b   : > { %v1757_v55 = vsel %vm1725_vm3, %v1709_v15, %v1741_v47 }
 0x33c   : > { %v1481_v24 = vpop.f32.mrf.mxu3  ;;  %v1782_v17 = vpack.c.bf16 %v1757_v55, %v1756_v56 }
 0x33d   : > { %v1596_v60 = vadd.f32 %v1595_v28, %v1481_v24 }
 0x33f   : > { %v1710_v30 = vadd.f32 %v3086_v1, %v1596_v60  ;;  %v1706_v1 = vadd.f32 %v3106_v16, %v1586_v40  ;;  %v1737_v16 = vmul.f32 0.01, %v1705_v4 }
 0x341   : > { %v1742_v42 = vmul.f32 0.01, %v1710_v30  ;;  %vm1726_vm1 = vcmp.gt.f32.partialorder %v1710_v30, 0.0  ;;  %v1738_v58 = vmul.f32 0.01, %v1706_v1  ;;  %vm1722_vm6 = vcmp.gt.f32.partialorder %v1706_v1, 0.0 }
 0x342   : > { %v1753_v21 = vsel %vm1721_vm7, %v1705_v4, %v1737_v16 }
 0x343   : > { %v1758_v54 = vsel %vm1726_vm1, %v1710_v30, %v1742_v42  ;;  %v1754_v59 = vsel %vm1722_vm6, %v1706_v1, %v1738_v58  ;;  %v1780_v31 = vpack.c.bf16 %v1753_v21, %v1752_v39  ;;  %v1853_v42 = vpop.permute.xlu0 %1852  ;;  %v1833_v1 = vpop.permute.xlu1 %1832 }
 0x344   : > { %v1483_v35 = vpop.f32.mrf.mxu3 }
 0x345   : > { %v1598_v37 = vadd.f32 %v1597_v34, %v1483_v35 }
 0x347   : > { %v1711_v41 = vadd.f32 %v3104_v11, %v1598_v37  ;;  %v1739_v11 = vmul.f32 0.01, %v1707_v44 }
 0x349   : > { %vm1727_vm2 = vcmp.gt.f32.partialorder %v1711_v41, 0.0  ;;  %v1743_v46 = vmul.f32 0.01, %v1711_v41  ;;  %v1755_v33 = vsel %vm1723_vm5, %v1707_v44, %v1739_v11 }
 0x34a   : > { %v1781_v63 = vpack.c.bf16 %v1755_v33, %v1754_v59 }
 0x34b   : > { %v1759_v50 = vsel %vm1727_vm2, %v1711_v41, %v1743_v46  ;;  %v1843_v46 = vpop.permute.xlu2 %1842  ;;  %v1838_v47 = vpop.permute.xlu0 %1837 }
 0x34c   : > { %v1783_v51 = vpack.c.bf16 %v1759_v50, %v1758_v54 }
 0x34e   : > { %1928 = vmatpush.bf16.msrb.mxu1 %v1783_v51  ;;  %2297 = vmatpush.bf16.msra.mxu2 %v1783_v51 }
 0x352   : > { %1929 = vmatpush.bf16.msrb.mxu1 %v1782_v17  ;;  %2298 = vmatpush.bf16.msra.mxu2 %v1782_v17 }
 0x353   : > { %v1828_v6 = vpop.permute.xlu2 %1827  ;;  %v1823_v33 = vpop.permute.xlu0 %1822 }
 0x356   : > { %1930 = vmatpush.bf16.msrb.mxu1 %v1781_v63  ;;  %2299 = vmatpush.bf16.msra.mxu2 %v1781_v63  ;;  %v1818_v63 = vpop.permute.xlu1 %1817 }
 0x35a   : > { %1931 = vmatpush.bf16.msrb.mxu1 %v1780_v31  ;;  %2300 = vmatpush.bf16.msra.mxu2 %v1780_v31 }
 0x35e   : > { %1932 = vmatpush.bf16.msrb.mxu1 %v3116_v2  ;;  %2301 = vmatpush.bf16.msra.mxu2 %v3116_v2 }
 0x362   : > { %1933 = vmatpush.bf16.msrb.mxu1 %v3114_v27  ;;  %2302 = vmatpush.bf16.msra.mxu2 %v3114_v27  ;;  %v2290_v27 = vld [vmem:[%s3221_s15 + $0x8] sm:$0xff] }
 0x366   : > { %1934 = vmatpush.bf16.msrb.mxu1 %v3112_v48  ;;  %2303 = vmatpush.bf16.msra.mxu2 %v3112_v48  ;;  %v2296_v48 = vld [vmem:[%s3221_s15 + $0x38] sm:$0xff] }
 0x36a   : > { %1935 = vmatpush.bf16.msrb.mxu1 %v3110_v5  ;;  %2304 = vmatpush.bf16.msra.mxu2 %v3110_v5  ;;  %v2292_v5 = vld [vmem:[%s3221_s15 + $0x18] sm:$0xff] }
 0x36d   : > { %1936 = vmatmul.bf16.vlgmr.msrb.gmra.mxu1 %v2289_v9  ;;  %1966 = vmatmul.bf16.vlgmr.msra.gmra.mxu2 %v2295_v38 }
 0x37d   : > { %1941 = vmatmul.bf16.gmra.mxu1 %v2290_v27  ;;  %1971 = vmatmul.bf16.gmra.mxu2 %v2296_v48 }
 0x38d   : > { %1946 = vmatmul.bf16.gmra.mxu1 %v2291_v0 }
 0x39d   : > { %1951 = vmatmul.bf16.gmra.mxu1 %v2292_v5 }
 0x3ad   : > { %1956 = vmatmul.bf16.gmra.mxu1 %v2293_v3  ;;  %v1813_v3 = vpop.permute.xlu2 %1812 }
 0x3bd   : > { %1961 = vmatmul.bf16.gmra.mxu1 %v2294_v13 }
 0x3ea   : > { %v3158_v8 = vpop.f32.mrf.mxu1 }
 0x3f0   : > { %v1967_v12 = vpop.f32.mrf.mxu2 }
 0x3f1   : > { %v1968_v7 = vadd.f32 %v1967_v12, %v1863_v25 }
 0x3f2   : > { %v3160_v14 = vpop.f32.mrf.mxu1 }
 0x3f3   : > { %v2005_v49 = vmul.f32 0.01, %v1968_v7  ;;  %vm1989_vm12 = vcmp.gt.f32.partialorder %v1968_v7, 0.0 }
 0x3f5   : > { %v2021_v36 = vsel %vm1989_vm12, %v1968_v7, %v2005_v49  ;;  %v2025_v7 = vld [vmem:[%s3223_s17] sm:$0x3] }
 0x3f8   : > { %v1969_v18 = vpop.f32.mrf.mxu2 }
 0x3f9   : > { %v1970_v23 = vadd.f32 %v1969_v18, %v1868_v62  ;;  %v1803_v62 = vpop.permute.xlu1 %1802 }
 0x3fa   : > { %v3162_v19 = vpop.f32.mrf.mxu1 }
 0x3fb   : > { %v2006_v60 = vmul.f32 0.01, %v1970_v23  ;;  %vm1990_vm11 = vcmp.gt.f32.partialorder %v1970_v23, 0.0  ;;  %v1943_v13 = vadd.f32 %v3162_v19, %v1813_v3 }
 0x3fd   : > { %v2022_v34 = vsel %vm1990_vm11, %v1970_v23, %v2006_v60  ;;  %vm1979_vm6 = vcmp.gt.f32.partialorder %v1943_v13, 0.0 }
 0x400   : > { %v1972_v2 = vpop.f32.mrf.mxu2 }
 0x401   : > { %v1973_v57 = vadd.f32 %v1972_v2, %v1873_v10 }
 0x402   : > { %v3164_v45 = vpop.f32.mrf.mxu1 }
 0x403   : > { %v2007_v28 = vmul.f32 0.01, %v1973_v57  ;;  %vm1991_vm10 = vcmp.gt.f32.partialorder %v1973_v57, 0.0  ;;  %v1945_v48 = vadd.f32 %v3164_v45, %v1818_v63  ;;  %v1938_v45 = vadd.f32 %v3158_v8, %v1803_v62 }
 0x405   : > { %v2023_v30 = vsel %vm1991_vm10, %v1973_v57, %v2007_v28  ;;  %v1996_v10 = vmul.f32 0.01, %v1945_v48  ;;  %vm1980_vm5 = vcmp.gt.f32.partialorder %v1945_v48, 0.0  ;;  %v1993_v25 = vmul.f32 0.01, %v1938_v45 }
 0x406   : > { %vm1977_vm8 = vcmp.gt.f32.partialorder %v1938_v45, 0.0  ;;  %v601_v28 = vld [vmem:[%s2597_s26 + $0x2] sm:$0x1]  ;;  %s2270_s26 = sshll.u32 %s3270_s3, 1 }
 0x407   : > { %v2009_v8 = vsel %vm1977_vm8, %v1938_v45, %v1993_v25  ;;  %s2066_s2 = scalar_lea.hbm %s3271_s27, %s2270_s26 }
 0x408   : > { %v1974_v22 = vpop.f32.mrf.mxu2  ;;  %s2070_s19 = sshll.u32 %s2066_s2, 4  ;;  %s2071_s19 = int_to_ptr.hbm [resolvable:$true] %s2070_s19 }
 0x409   : > { %v1975_v53 = vadd.f32 %v1974_v22, %v1878_v61  ;;  %v1808_v61 = vpop.permute.xlu0 %1807  ;;  %v1995_v22 = vmul.f32 0.01, %v1943_v13  ;;  %s2375_s5 = sshra.s32 %s2071_s19, 4  ;;  %s2376_s5 = int_to_ptr.hbm [resolvable:$true] %s2375_s5 }
 0x40a   : > { %v1947_v26 = vpop.f32.mrf.mxu1  ;;  %v1940_v2 = vadd.f32 %v3160_v14, %v1808_v61  ;;  %s2377_s3 = scalar_lea.hbm %s2376_s5, 2  ;;  %p2382_p0 = scmp.lt.s32.totalorder %s2376_s5, %s3271_s27 }
 0x40b   : > { %vm1992_vm9 = vcmp.gt.f32.partialorder %v1975_v53, 0.0  ;;  %v2008_v24 = vmul.f32 0.01, %v1975_v53  ;;  %v1948_v9 = vadd.f32 %v1947_v26, %v1823_v33  ;;  %v2011_v26 = vsel %vm1979_vm6, %v1943_v13, %v1995_v22  ;;  %p2378_p11 = scmp.ne.s32.totalorder %s2376_s5, %s2377_s3  ;;  %p2383_p1 = scmp.lt.s32.totalorder %s2381_s25, %s2377_s3 }
 0x40c   : > { %v1994_v19 = vmul.f32 0.01, %v1940_v2  ;;  %vm1978_vm7 = vcmp.gt.f32.partialorder %v1940_v2, 0.0 }
 0x40d   : > { %v2024_v29 = vsel %vm1992_vm9, %v1975_v53, %v2008_v24  ;;  %v1997_v12 = vmul.f32 0.01, %v1948_v9  ;;  %vm1981_vm4 = vcmp.gt.f32.partialorder %v1948_v9, 0.0  ;;  %v2012_v53 = vsel %vm1980_vm5, %v1945_v48, %v1996_v10  ;;  %p2379_p12 = pnand %p2378_p11, %p2570_p5  ;;  %p2384_p2 = por %p2383_p1, %p2382_p0 }
 0x40e   : > { %2032 = vmatpush.msrb.mxu2 %v2024_v29  ;;  %v2010_v14 = vsel %vm1978_vm7, %v1940_v2, %v1994_v19  ;;  %v602_v24 = vmul.f32 6.437752, %v601_v28 }
 0x40f   : > { %v2013_v23 = vsel %vm1981_vm4, %v1948_v9, %v1997_v12  ;;  %p2380_p13 = pneg %p2379_p12 }
 0x410   : > { %2033 = vmatpush.msrb.mxu2 %v2023_v30  ;;  %v603_v60 = vmul.f32 1.442695, %v602_v24 }
 0x411   : > { %p2385_p3 = pnand %p2384_p2, %p2380_p13 }
 0x412   : > { %v1949_v35 = vpop.f32.mrf.mxu1  ;;  %2034 = vmatpush.msrb.mxu2 %v2022_v34  ;;  %2357 = vpow2.f32 %v603_v60 }
 0x413   : > { %v1950_v21 = vadd.f32 %v1949_v35, %v1828_v6 }
 0x414   : > { %2035 = vmatpush.msrb.mxu2 %v2021_v36 }
 0x415   : > { %v1998_v0 = vmul.f32 0.01, %v1950_v21  ;;  %vm1982_vm3 = vcmp.gt.f32.partialorder %v1950_v21, 0.0 }
 0x417   : > { %v2014_v57 = vsel %vm1982_vm3, %v1950_v21, %v1998_v0 }
 0x418   : > { %v2358_v29 = vpop.eup %2357 }
 0x419   : > { %v2136_v49 = vadd.f32 -1.0, %v2358_v29 }
 0x41a   : > { %v1952_v15 = vpop.f32.mrf.mxu1 }
 0x41b   : > { %v1953_v16 = vadd.f32 %v1952_v15, %v1833_v1  ;;  %v606_v30 = vmul.f32 0.15533373, %v2136_v49 }
 0x41d   : > { %v1999_v38 = vmul.f32 0.01, %v1953_v16  ;;  %vm1983_vm2 = vcmp.gt.f32.partialorder %v1953_v16, 0.0  ;;  %2359 = vrsqrt.f32 %v606_v30  ;;  %vm613_vm9 = vweird.f32 %v606_v30 }
 0x41f   : > { %v2015_v18 = vsel %vm1983_vm2, %v1953_v16, %v1999_v38 }
 0x422   : > { %v1954_v37 = vpop.f32.mrf.mxu1 }
 0x423   : > { %v1955_v56 = vadd.f32 %v1954_v37, %v1838_v47  ;;  %v2360_v34 = vpop.eup %2359 }
 0x424   : > { %v608_v35 = vmul.f32 %v2360_v34, %v606_v30  ;;  %vm614_vm10 = vweird.f32 %v2360_v34 }
 0x425   : > { %v2000_v39 = vmul.f32 0.01, %v1955_v56  ;;  %vm1984_vm1 = vcmp.gt.f32.partialorder %v1955_v56, 0.0  ;;  %vm615_vm11 = vmor %vm613_vm9, %vm614_vm10 }
 0x426   : > { %v609_v36 = vmul.f32 %v2360_v34, %v608_v35 }
 0x427   : > { %v2016_v5 = vsel %vm1984_vm1, %v1955_v56, %v2000_v39 }
 0x428   : > { %v610_v15 = vmul.f32 0.5, %v609_v36 }
 0x42a   : > { %v1957_v40 = vpop.f32.mrf.mxu1  ;;  %v611_v37 = vsub.f32 1.5, %v610_v15 }
 0x42b   : > { %v1958_v4 = vadd.f32 %v1957_v40, %v1843_v46 }
 0x42c   : > { %v612_v40 = vmul.f32 %v2360_v34, %v611_v37 }
 0x42d   : > { %v2001_v59 = vmul.f32 0.01, %v1958_v4  ;;  %vm1985_vm0 = vcmp.gt.f32.partialorder %v1958_v4, 0.0 }
 0x42f   : > { %v2017_v27 = vsel %vm1985_vm0, %v1958_v4, %v2001_v59 }
 0x432   : > { %v1959_v41 = vpop.f32.mrf.mxu1 }
 0x433   : > { %v1960_v32 = vadd.f32 %v1959_v41, %v1848_v43 }
 0x435   : > { %v2002_v58 = vmul.f32 0.01, %v1960_v32  ;;  %vm1986_vm15 = vcmp.gt.f32.partialorder %v1960_v32, 0.0 }
 0x437   : > { %v2018_v31 = vsel %vm1986_vm15, %v1960_v32, %v2002_v58 }
 0x43a   : > { %v1962_v44 = vpop.f32.mrf.mxu1 }
 0x43b   : > { %v1963_v54 = vadd.f32 %v1962_v44, %v1853_v42  ;;  %v2030_v42 = vpop.permute.xlu2 %2029 }
 0x43d   : > { %v2003_v55 = vmul.f32 0.01, %v1963_v54  ;;  %vm1987_vm14 = vcmp.gt.f32.partialorder %v1963_v54, 0.0 }
 0x43f   : > { %v2019_v20 = vsel %vm1987_vm14, %v1963_v54, %v2003_v55 }
 0x442   : > { %v1964_v50 = vpop.f32.mrf.mxu1 }
 0x443   : > { %v1965_v51 = vadd.f32 %v1964_v50, %v1858_v52  ;;  %v616_v52 = vsel %vm615_vm11, %v2360_v34, %v612_v40 }
 0x444   : > { %v2052_v41 = vperm.slane %v616_v52, 0 }
 0x445   : > { %v2004_v11 = vmul.f32 0.01, %v1965_v51  ;;  %vm1988_vm13 = vcmp.gt.f32.partialorder %v1965_v51, 0.0 }
 0x447   : > { %v2020_v17 = vsel %vm1988_vm13, %v1965_v51, %v2004_v11 }
 0x448   : > { %2036 = vmatpush.msrb.mxu2 %v2020_v17 }
 0x44a   : > { %2037 = vmatpush.msrb.mxu2 %v2019_v20 }
 0x44c   : > { %2038 = vmatpush.msrb.mxu2 %v2018_v31 }
 0x44e   : > { %2039 = vmatpush.msrb.mxu2 %v2017_v27 }
 0x450   : > { %2040 = vmatpush.msrb.mxu2 %v2016_v5 }
 0x452   : > { %2041 = vmatpush.msrb.mxu2 %v2015_v18 }
 0x454   : > { %2042 = vmatpush.msrb.mxu2 %v2014_v57 }
 0x456   : > { %2043 = vmatpush.msrb.mxu2 %v2013_v23 }
 0x458   : > { %2044 = vmatpush.msrb.mxu2 %v2012_v53 }
 0x45a   : > { %2045 = vmatpush.msrb.mxu2 %v2011_v26 }
 0x45c   : > { %2046 = vmatpush.msrb.mxu2 %v2010_v14 }
 0x45e   : > { %2047 = vmatpush.msrb.mxu2 %v2009_v8 }
 0x45f   : > { %2048 = vmatmul.f32.vlgmr.msrb.gmra.mxu2 %v2025_v7 }
 0x4e2   : > { %v2049_v43 = vpop.f32.mrf.mxu2 }
 0x4e3   : > { %v2050_v44 = vadd.f32 %v2049_v43, %v2030_v42 }
 0x4e5   : > { %v2053_v46 = vmul.f32 %v2052_v41, %v2050_v44 }
 0x4e7   : > { %2054 = vst [vmem:[%s593_s0] sm:$0x3] %v2053_v46 }
 0x4e8   : > { %2388 = shalt.err (!%p2385_p3)
}
 0x4e9   : > { %2305 = dma.vmem_to_hbm [thread:$0]  (%p2570_p5), %s2069_s21, 32, %s2071_s19, %s2056_s4  }
 0x4ea PF: > { %s3273_s23 = sld [smem:[#allocation7_spill]] }
 0x4eb   : > { %s3274_s2 = sld [smem:[#allocation5_spill]] }
 0x4f0   : > { %p2311_p4 = scmp.ge.s32.totalorder %s3273_s23, 2 }
 0x4f1   : > { %s2082_s7 = sand.u32 1, %s3274_s2  }
 0x4f2   : > { %p2308_p7 = pnand %p2311_p4, %p2574_p6  ;;  %s2083_s26 = scalar_lea.sflag [#allocation3], %s2082_s7 }
 0x4f4   : > { %p2309_p8 = pneg %p2308_p7 }
 0x4f6   : > { %2406 = dma.done.wait (%p2309_p8), %s2083_s26, 32  }
 0x4f7   : > { %2408 = vsyncadd (%p2309_p8), %s2083_s26, 4294967264  ;;  %s3276_s21 = sld [smem:[#allocation9_spill]]  ;;  %s3279_s0 = smov %s2415_s30 }
 0x4f8   : > { %s3277_s5 = sld [smem:[#allocation6_spill]] }
 0x4f9   : > { %s3278_s20 = sld [smem:[#allocation10_spill]] }
 0x4fd   : > { %p29_p9 = scmp.ge.s32.totalorder %s3276_s21, 6  }
 0x4fe   : > { %s3280_s30 = smov %s3277_s5 }
 0x4ff   :  { %31 = sbr.rel (!%p29_p9) target bundleno = 13 (0xd), region = 131 }
 0x504   :  { %2089 = vsyncpa [#allocation3], 1 }
 0x505   :  { %2091 = vsyncpa [#allocation3 + $0x1], 1 }

</bundles_post_ra>
